<compile_context>
chip_gen: v6e
topology: v6e:2x2x1
jax: 0.10.0
libtpu: 0.0.40
codegen_flags: <defaults>
</compile_context>

<pallas_src>
import functools
from collections import namedtuple

import numpy as np
import jax
import jax.numpy as jnp
from jax.experimental import pallas as pl
from jax.experimental.pallas import tpu as pltpu
from jax.scipy.linalg import block_diag

BN_EPS = 1e-5

Genotype = namedtuple("Genotype", "normal normal_concat reduce reduce_concat")
DARTS_V2 = Genotype(
    normal=[('sep_conv_3x3', 0), ('sep_conv_3x3', 1), ('sep_conv_3x3', 0),
            ('sep_conv_3x3', 1), ('sep_conv_3x3', 1), ('skip_connect', 0),
            ('skip_connect', 0), ('dil_conv_3x3', 2)],
    normal_concat=[2, 3, 4, 5],
    reduce=[('max_pool_3x3', 0), ('max_pool_3x3', 1), ('skip_connect', 2),
            ('max_pool_3x3', 1), ('max_pool_3x3', 0), ('skip_connect', 2),
            ('skip_connect', 2), ('max_pool_3x3', 1)],
    reduce_concat=[2, 3, 4, 5],
)


# ---------------------------------------------------------------------------
# Static trace-time plan: conv blocks, per-op structure, and a "wave" schedule
# (each wave = blocks whose inputs are all ready -> one block-diagonal 1x1 conv).
# ---------------------------------------------------------------------------
def _build_cell_plan(genotype):
    """blocks[i] = (src, dil) with src = ("state", s) | ("block", j)
       ops[i]    = ("skip", src_state, ()) | ("conv", src_state, (block ids,))
       waves     = tuple of tuples of block ids (stacked into one MXU push each)
       node_schedule[w] = state indices (>=2) that become available after wave w
       pre_nodes = state indices available before any wave (all-skip nodes)."""
    ops, blocks = [], []
    for name, idx in genotype.normal:
        if name == 'skip_connect':
            ops.append(("skip", idx, ()))                 # stride 1 -> Identity
        elif name == 'sep_conv_3x3':                      # two relu->dw->pw->bn blocks
            b0 = len(blocks); blocks.append((("state", idx), 1))
            b1 = len(blocks); blocks.append((("block", b0), 1))
            ops.append(("conv", idx, (b0, b1)))
        elif name == 'dil_conv_3x3':                      # one block, dilation 2
            b0 = len(blocks); blocks.append((("state", idx), 2))
            ops.append(("conv", idx, (b0,)))
        else:
            # TODO(synk): pooling / factorized-reduce ops (reduction cells) not implemented.
            raise NotImplementedError(name)

    n_nodes = len(genotype.normal) // 2
    avail_states, done_blocks = {0, 1}, set()

    def op_ready(op):
        kind, src, bl = op
        return (src in avail_states) if kind == "skip" else (bl[-1] in done_blocks)

    def src_ready(src):
        kind, i = src
        return (i in avail_states) if kind == "state" else (i in done_blocks)

    def release_states():
        new, changed = [], True
        while changed:
            changed = False
            for node in range(n_nodes):
                s = node + 2
                if s in avail_states:
                    continue
                if op_ready(ops[2 * node]) and op_ready(ops[2 * node + 1]):
                    avail_states.add(s); new.append(s); changed = True
        return tuple(new)

    pre_nodes = release_states()
    remaining = set(range(len(blocks)))
    waves, node_schedule = [], []
    while remaining:
        ready = tuple(sorted(b for b in remaining if src_ready(blocks[b][0])))
        assert ready, "unschedulable cell plan"
        waves.append(ready)
        done_blocks.update(ready)
        remaining.difference_update(ready)
        node_schedule.append(release_states())

    return (tuple(blocks), tuple(ops), tuple(waves),
            tuple(node_schedule), pre_nodes)


def _tap_masks(H, W, spg, dils):
    """mask[di*9+k, s*HW + h*W + w] = 1 iff the 3x3 tap (dilation dils[di], tap k)
    reads an in-bounds pixel for output (h, w).  Also zeroes cross-sample wraps of the
    lane roll (crossing a sample boundary always implies h+dy outside [0, H))."""
    HW = H * W
    m = np.zeros((len(dils) * 9, spg * HW), np.float32)
    for di, d in enumerate(dils):
        for k in range(9):
            dy, dx = (k // 3 - 1) * d, (k % 3 - 1) * d
            for s in range(spg):
                for h in range(H):
                    for w in range(W):
                        if 0 <= h + dy < H and 0 <= w + dx < W:
                            m[di * 9 + k, s * HW + h * W + w] = 1.0
    return jnp.asarray(m)


# ---------------------------------------------------------------------------
# Fused whole-cell kernel.  One grid step == spg batch samples packed on lanes.
# Activations are (C, L) with L = spg*HW (lane-dense, >=128 for the test shape).
# ---------------------------------------------------------------------------
def _new_cell_kernel(*refs, C, W, L, blocks, ops, waves, node_schedule,
                     pre_nodes, concat, dil_offsets):
    n_waves = len(waves)
    s0_ref, s1_ref, pre_w_ref, pre_b_ref, mask_ref = refs[:5]
    dwb_refs = refs[5:5 + n_waves]
    ww_refs = refs[5 + n_waves:5 + 2 * n_waves]
    out_ref = refs[5 + 2 * n_waves]

    f32, bf16 = jnp.float32, jnp.bfloat16
    relu = lambda x: jnp.maximum(x, 0.0)

    # ---- preprocess0 / preprocess1: single block-diagonal 1x1 conv (one MXU push)
    xin = jnp.concatenate([relu(s0_ref[0].astype(f32)),
                           relu(s1_ref[0].astype(f32))], axis=0)
    pre = jnp.dot(pre_w_ref[...], xin.astype(bf16),
                  preferred_element_type=f32) + pre_b_ref[...]
    states = {0: pre[:C, :], 1: pre[C:2 * C, :]}
    block_out = {}

    def tensor(src):
        kind, i = src
        return states[i] if kind == "state" else block_out[i]

    # ---- depthwise 3x3 taps: lane roll (XLU) + boundary mask (VPU),
    #      CSE'd per distinct (source tensor, dilation).
    tap_cache = {}

    def taps(src, dil):
        key = (src, dil)
        if key not in tap_cache:
            x = relu(tensor(src))
            row0 = dil_offsets[dil]
            ts = []
            for k in range(9):
                dy = (k // 3 - 1) * dil
                dx = (k % 3 - 1) * dil
                delta = dy * W + dx
                if delta == 0:
                    ts.append(x)                       # centre tap: always in-bounds
                else:
                    shifted = pltpu.roll(x, (-delta) % L, axis=1)  # out[j] = x[j+delta]
                    ts.append(shifted * mask_ref[row0 + k:row0 + k + 1, :])
            tap_cache[key] = ts
        return tap_cache[key]

    def node_value(s):                                 # sum of the node's two op outputs
        vals = []
        for op in (ops[2 * (s - 2)], ops[2 * (s - 2) + 1]):
            kind, src_state, bl = op
            vals.append(states[src_state] if kind == "skip" else block_out[bl[-1]])
        return vals[0] + vals[1]

    for s in pre_nodes:
        states[s] = node_value(s)

    # ---- wave schedule: per wave, the depthwise outputs of all ready blocks are
    #      stacked on sublanes and pushed through ONE block-diagonal 1x1 conv.
    for w, wave in enumerate(waves):
        dwb = dwb_refs[w]                              # (kC, 10): 9 dw taps + BN bias
        parts = []
        for j, b in enumerate(wave):
            src, dil = blocks[b]
            ts = taps(src, dil)
            r = j * C
            acc = dwb[r:r + C, 0:1] * ts[0]
            for k in range(1, 9):
                acc = acc + dwb[r:r + C, k:k + 1] * ts[k]
            parts.append(acc)
        stacked = parts[0] if len(parts) == 1 else jnp.concatenate(parts, axis=0)
        y = jnp.dot(ww_refs[w][...], stacked.astype(bf16),
                    preferred_element_type=f32) + dwb[:, 9:10]
        for j, b in enumerate(wave):
            block_out[b] = y[j * C:(j + 1) * C, :]
        for s in node_schedule[w]:
            states[s] = node_value(s)

    # ---- channel concat: one aligned (4C, L) store with lane width L (>=128)
    out_ref[0] = jnp.concatenate([states[s] for s in concat],
                                 axis=0).astype(out_ref.dtype)


# ---------------------------------------------------------------------------
# Parameter init (deterministic; PyTorch-shaped tensors)
# ---------------------------------------------------------------------------
def init_new_cell_params(key, genotype, c_prev_prev, c_prev, c):
    n_blocks = len(_build_cell_plan(genotype)[0])
    keys = jax.random.split(key, 2 + n_blocks)

    def init_pre(k, cin, cout):
        kw, kg, kb = jax.random.split(k, 3)
        return {"w": jax.random.normal(kw, (cout, cin), jnp.float32) / (cin ** 0.5),
                "gamma": 1.0 + 0.1 * jax.random.normal(kg, (cout,), jnp.float32),
                "beta": 0.1 * jax.random.normal(kb, (cout,), jnp.float32)}

    def init_block(k, cc):
        k1, k2, k3, k4 = jax.random.split(k, 4)
        return {"dw": 0.2 * jax.random.normal(k1, (cc, 3, 3), jnp.float32),
                "pw": jax.random.normal(k2, (cc, cc), jnp.float32) / (cc ** 0.5),
                "gamma": 1.0 + 0.1 * jax.random.normal(k3, (cc,), jnp.float32),
                "beta": 0.1 * jax.random.normal(k4, (cc,), jnp.float32)}

    return {"pre0": init_pre(keys[0], c_prev_prev, c),
            "pre1": init_pre(keys[1], c_prev, c),
            "blocks": [init_block(keys[2 + j], c) for j in range(n_blocks)]}


# ---------------------------------------------------------------------------
# Forward (single pallas_call)
# ---------------------------------------------------------------------------
def new_cell_forward(params, s0_nchw, s1_nchw, genotype):
    N, C0, H, W = s0_nchw.shape
    _, C1, _, _ = s1_nchw.shape
    C = params["pre0"]["gamma"].shape[0]
    HW = H * W
    blocks, ops, waves, node_schedule, pre_nodes = _build_cell_plan(genotype)
    concat = tuple(genotype.normal_concat)
    n_out = len(concat) * C

    # Samples-per-grid-step: fill the lane axis to >=128 first (biggest measured lever);
    # for larger N the grid stays >= 2 so both v7x TensorCores get work.
    want = max(1, -(-128 // HW))                       # ceil(128 / HW)
    spg = max(d for d in range(1, min(N, want) + 1) if N % d == 0)
    G, L = N // spg, spg * HW

    def pack(x):                                       # (N, c, H, W) -> (G, c, L)
        c = x.shape[1]
        return (x.reshape(G, spg, c, HW).transpose(0, 2, 1, 3).reshape(G, c, L))

    s0p, s1p = pack(s0_nchw), pack(s1_nchw)

    # Eval-mode BN folded into the 1x1 conv weights (running stats assumed 0 / 1).
    def fold(w, gamma, beta):
        scale = gamma / jnp.sqrt(1.0 + BN_EPS)
        return w * scale[:, None], beta.reshape(-1, 1)

    p0w, p0b = fold(params["pre0"]["w"], params["pre0"]["gamma"], params["pre0"]["beta"])
    p1w, p1b = fold(params["pre1"]["w"], params["pre1"]["gamma"], params["pre1"]["beta"])
    pre_w = block_diag(p0w, p1w).astype(jnp.bfloat16)          # (2C, C0+C1)
    pre_b = jnp.concatenate([p0b, p1b], axis=0)                # (2C, 1)

    wave_w, wave_dwb = [], []
    for wave in waves:
        wmats, dwbs = [], []
        for b in wave:
            bp = params["blocks"][b]
            wf, bf_ = fold(bp["pw"], bp["gamma"], bp["beta"])
            wmats.append(wf)
            dwbs.append(jnp.concatenate([bp["dw"].reshape(C, 9), bf_], axis=1))
        wave_w.append(block_diag(*wmats).astype(jnp.bfloat16))  # (kC, kC) block-diag
        wave_dwb.append(jnp.concatenate(dwbs, axis=0))           # (kC, 10) dw taps + bias

    dils = tuple(sorted({d for (_, d) in blocks}))
    dil_offsets = {d: 9 * i for i, d in enumerate(dils)}
    mask = _tap_masks(H, W, spg, dils)                           # (len(dils)*9, L)

    kernel = functools.partial(
        _new_cell_kernel, C=C, W=W, L=L, blocks=blocks, ops=ops, waves=waves,
        node_schedule=node_schedule, pre_nodes=pre_nodes, concat=concat,
        dil_offsets=dil_offsets)

    def const_spec(a):                                 # full-array, never re-fetched
        zeros = (0,) * a.ndim
        return pl.BlockSpec(a.shape, lambda g: zeros)

    out = pl.pallas_call(
        kernel,
        out_shape=jax.ShapeDtypeStruct((G, n_out, L), jnp.float32),
        grid=(G,),
        in_specs=[pl.BlockSpec((1, C0, L), lambda g: (g, 0, 0)),
                  pl.BlockSpec((1, C1, L), lambda g: (g, 0, 0)),
                  const_spec(pre_w), const_spec(pre_b), const_spec(mask)]
                 + [const_spec(a) for a in wave_dwb]
                 + [const_spec(a) for a in wave_w],
        out_specs=pl.BlockSpec((1, n_out, L), lambda g: (g, 0, 0)),
        compiler_params=pltpu.CompilerParams(
            dimension_semantics=("parallel",),         # batch groups -> both TCs on v7x
        ),
    )(s0p, s1p, pre_w, pre_b, mask, *wave_dwb, *wave_w)

    return (out.reshape(G, n_out, spg, HW).transpose(0, 2, 1, 3)
               .reshape(N, n_out, H, W))


# ---------------------------------------------------------------------------
# Pure-JAX reference (eval-mode BN), used only for the self-check in __main__
# ---------------------------------------------------------------------------
def new_cell_reference(params, s0, s1, genotype):
    hi = jax.lax.Precision.HIGHEST

    def bn(x, gamma, beta):
        scale = gamma / jnp.sqrt(1.0 + BN_EPS)
        return x * scale[None, :, None, None] + beta[None, :, None, None]

    def conv1x1(x, w):
        return jnp.einsum("oi,nihw->nohw", w, x, precision=hi)

    def dwconv3x3(x, wdw, dil):
        n, c, h, wd = x.shape
        xp = jnp.pad(x, ((0, 0), (0, 0), (dil, dil), (dil, dil)))
        out = jnp.zeros_like(x)
        for kh in range(3):
            for kw in range(3):
                out = out + (wdw[None, :, kh, kw, None, None]
                             * xp[:, :, kh * dil:kh * dil + h, kw * dil:kw * dil + wd])
        return out

    def relu(x):
        return jnp.maximum(x, 0.0)

    def pre(p, x):
        return bn(conv1x1(relu(x), p["w"]), p["gamma"], p["beta"])

    def block(b, x, dil):
        t = dwconv3x3(relu(x), b["dw"], dil)
        return bn(conv1x1(t, b["pw"]), b["gamma"], b["beta"])

    states = [pre(params["pre0"], s0), pre(params["pre1"], s1)]
    bi = 0
    for i in range(len(genotype.normal) // 2):
        hs = []
        for j in (2 * i, 2 * i + 1):
            name, idx = genotype.normal[j]
            x = states[idx]
            if name == "skip_connect":
                hs.append(x)
            elif name == "sep_conv_3x3":
                t = block(params["blocks"][bi], x, 1)
                t = block(params["blocks"][bi + 1], t, 1)
                bi += 2
                hs.append(t)
            elif name == "dil_conv_3x3":
                hs.append(block(params["blocks"][bi], x, 2))
                bi += 1
            else:
                raise NotImplementedError(name)
        states.append(hs[0] + hs[1])
    return jnp.concatenate([states[i] for i in genotype.normal_concat], axis=1)


if __name__ == "__main__":
    N, C_prev_prev, C_prev, C, H, W = 2, 8, 8, 8, 8, 8
    key = jax.random.PRNGKey(0)
    k_s0, k_s1, k_par = jax.random.split(key, 3)

    s0 = jax.random.normal(k_s0, (N, C_prev_prev, H, W), jnp.float32)
    s1 = jax.random.normal(k_s1, (N, C_prev, H, W), jnp.float32)
    params = init_new_cell_params(k_par, DARTS_V2, C_prev_prev, C_prev, C)

    fwd = jax.jit(functools.partial(new_cell_forward, genotype=DARTS_V2))
    out = jax.block_until_ready(fwd(params, s0, s1))

    expected = (N, len(DARTS_V2.normal_concat) * C, H, W)
    assert out.shape == expected, (out.shape, expected)
    assert bool(jnp.all(jnp.isfinite(out)))

    # numerical self-check against a pure-JAX f32 reference (tolerance accommodates
    # bf16 MXU operands with f32 accumulation; depthwise/BN paths stay f32)
    ref = new_cell_reference(params, s0, s1, DARTS_V2)
    rel_err = float(jnp.max(jnp.abs(out - ref)) / (jnp.max(jnp.abs(ref)) + 1e-6))
    assert rel_err < 5e-2, f"kernel/reference mismatch: rel max err = {rel_err}"

    print("KERNEL_OK")
</pallas_src>

<mosaic_0001>
module attributes {stable_mosaic.version = 11 : i64} {
  func.func @_new_cell_kernel(%arg0: i32, %arg1: memref<1x8x128xf32, #tpu.memory_space<vmem>>, %arg2: memref<1x8x128xf32, #tpu.memory_space<vmem>>, %arg3: memref<16x16xbf16, #tpu.memory_space<vmem>>, %arg4: memref<16x1xf32, #tpu.memory_space<vmem>>, %arg5: memref<18x128xf32, #tpu.memory_space<vmem>>, %arg6: memref<40x10xf32, #tpu.memory_space<vmem>>, %arg7: memref<40x10xf32, #tpu.memory_space<vmem>>, %arg8: memref<8x10xf32, #tpu.memory_space<vmem>>, %arg9: memref<40x40xbf16, #tpu.memory_space<vmem>>, %arg10: memref<40x40xbf16, #tpu.memory_space<vmem>>, %arg11: memref<8x8xbf16, #tpu.memory_space<vmem>>, %arg12: memref<1x32x128xf32, #tpu.memory_space<vmem>>) attributes {dimension_semantics = [#tpu.dimension_semantics<parallel>], iteration_bounds = array<i64: 1>, scalar_prefetch = 0 : i64, scratch_operands = 0 : i64, tpu.core_type = #tpu.core_type<tc>, window_params = [{transform_indices = @transform_0, window_bounds = array<i64: 1, 8, 128>}, {transform_indices = @transform_1, window_bounds = array<i64: 1, 8, 128>}, {pipeline_mode = #tpu.pipeline_mode<synchronous>, transform_indices = @transform_2, window_bounds = array<i64: 16, 16>}, {pipeline_mode = #tpu.pipeline_mode<synchronous>, transform_indices = @transform_3, window_bounds = array<i64: 16, 1>}, {pipeline_mode = #tpu.pipeline_mode<synchronous>, transform_indices = @transform_4, window_bounds = array<i64: 18, 128>}, {pipeline_mode = #tpu.pipeline_mode<synchronous>, transform_indices = @transform_5, window_bounds = array<i64: 40, 10>}, {pipeline_mode = #tpu.pipeline_mode<synchronous>, transform_indices = @transform_6, window_bounds = array<i64: 40, 10>}, {pipeline_mode = #tpu.pipeline_mode<synchronous>, transform_indices = @transform_7, window_bounds = array<i64: 8, 10>}, {pipeline_mode = #tpu.pipeline_mode<synchronous>, transform_indices = @transform_8, window_bounds = array<i64: 40, 40>}, {pipeline_mode = #tpu.pipeline_mode<synchronous>, transform_indices = @transform_9, window_bounds = array<i64: 40, 40>}, {pipeline_mode = #tpu.pipeline_mode<synchronous>, transform_indices = @transform_10, window_bounds = array<i64: 8, 8>}, {transform_indices = @transform_11, window_bounds = array<i64: 1, 32, 128>}]} {
    %c0 = arith.constant 0 : index
    %c0_0 = arith.constant 0 : index
    %c0_1 = arith.constant 0 : index
    %0 = vector.load %arg1[%c0, %c0_0, %c0_1] : memref<1x8x128xf32, #tpu.memory_space<vmem>>, vector<1x8x128xf32>
    %1 = vector.shape_cast %0 : vector<1x8x128xf32> to vector<8x128xf32>
    %cst = arith.constant 0.000000e+00 : f32
    %2 = vector.broadcast %cst : f32 to vector<8x128xf32>
    %3 = arith.maximumf %1, %2 : vector<8x128xf32>
    %c0_2 = arith.constant 0 : index
    %c0_3 = arith.constant 0 : index
    %c0_4 = arith.constant 0 : index
    %4 = vector.load %arg2[%c0_2, %c0_3, %c0_4] : memref<1x8x128xf32, #tpu.memory_space<vmem>>, vector<1x8x128xf32>
    %5 = vector.shape_cast %4 : vector<1x8x128xf32> to vector<8x128xf32>
    %cst_5 = arith.constant 0.000000e+00 : f32
    %6 = vector.broadcast %cst_5 : f32 to vector<8x128xf32>
    %7 = arith.maximumf %5, %6 : vector<8x128xf32>
    %8 = tpu.concatenate %3, %7 in 0 : vector<8x128xf32>, vector<8x128xf32> -> vector<16x128xf32>
    %c0_6 = arith.constant 0 : index
    %c0_7 = arith.constant 0 : index
    %9 = vector.load %arg3[%c0_6, %c0_7] : memref<16x16xbf16, #tpu.memory_space<vmem>>, vector<16x16xbf16>
    %10 = arith.truncf %8 : vector<16x128xf32> to vector<16x128xbf16>
    %cst_8 = arith.constant dense<0.000000e+00> : vector<16x128xf32>
    %11 = tpu.matmul %9, %10, %cst_8 {dimension_numbers = #tpu.dot_dimension_numbers<[1], [0], [0], [1], [0, 0, 1, 1], [], []>} : vector<16x16xbf16>, vector<16x128xbf16>, vector<16x128xf32> -> vector<16x128xf32>
    %c0_9 = arith.constant 0 : index
    %c0_10 = arith.constant 0 : index
    %12 = vector.load %arg4[%c0_9, %c0_10] : memref<16x1xf32, #tpu.memory_space<vmem>>, vector<16x1xf32>
    %13 = vector.broadcast %12 : vector<16x1xf32> to vector<16x128xf32>
    %14 = arith.addf %11, %13 : vector<16x128xf32>
    %15 = vector.extract_strided_slice %14 {offsets = [0, 0], sizes = [8, 128], strides = [1, 1]} : vector<16x128xf32> to vector<8x128xf32>
    %16 = vector.extract_strided_slice %14 {offsets = [8, 0], sizes = [8, 128], strides = [1, 1]} : vector<16x128xf32> to vector<8x128xf32>
    %cst_11 = arith.constant 0.000000e+00 : f32
    %17 = vector.broadcast %cst_11 : f32 to vector<8x128xf32>
    %18 = arith.maximumf %15, %17 : vector<8x128xf32>
    %c9_i32 = arith.constant 9 : i32
    %19 = tpu.dynamic_rotate %18 by %c9_i32 dim 1 : vector<8x128xf32>, i32 -> vector<8x128xf32>
    %c0_12 = arith.constant 0 : index
    %c0_13 = arith.constant 0 : index
    %20 = vector.load %arg5[%c0_12, %c0_13] : memref<18x128xf32, #tpu.memory_space<vmem>>, vector<1x128xf32>
    %21 = vector.broadcast %20 : vector<1x128xf32> to vector<8x128xf32>
    %22 = arith.mulf %19, %21 : vector<8x128xf32>
    %c8_i32 = arith.constant 8 : i32
    %23 = tpu.dynamic_rotate %18 by %c8_i32 dim 1 : vector<8x128xf32>, i32 -> vector<8x128xf32>
    %c1 = arith.constant 1 : index
    %c0_14 = arith.constant 0 : index
    %24 = vector.load %arg5[%c1, %c0_14] : memref<18x128xf32, #tpu.memory_space<vmem>>, vector<1x128xf32>
    %25 = vector.broadcast %24 : vector<1x128xf32> to vector<8x128xf32>
    %26 = arith.mulf %23, %25 : vector<8x128xf32>
    %c7_i32 = arith.constant 7 : i32
    %27 = tpu.dynamic_rotate %18 by %c7_i32 dim 1 : vector<8x128xf32>, i32 -> vector<8x128xf32>
    %c2 = arith.constant 2 : index
    %c0_15 = arith.constant 0 : index
    %28 = vector.load %arg5[%c2, %c0_15] : memref<18x128xf32, #tpu.memory_space<vmem>>, vector<1x128xf32>
    %29 = vector.broadcast %28 : vector<1x128xf32> to vector<8x128xf32>
    %30 = arith.mulf %27, %29 : vector<8x128xf32>
    %c1_i32 = arith.constant 1 : i32
    %31 = tpu.dynamic_rotate %18 by %c1_i32 dim 1 : vector<8x128xf32>, i32 -> vector<8x128xf32>
    %c3 = arith.constant 3 : index
    %c0_16 = arith.constant 0 : index
    %32 = vector.load %arg5[%c3, %c0_16] : memref<18x128xf32, #tpu.memory_space<vmem>>, vector<1x128xf32>
    %33 = vector.broadcast %32 : vector<1x128xf32> to vector<8x128xf32>
    %34 = arith.mulf %31, %33 : vector<8x128xf32>
    %c127_i32 = arith.constant 127 : i32
    %35 = tpu.dynamic_rotate %18 by %c127_i32 dim 1 : vector<8x128xf32>, i32 -> vector<8x128xf32>
    %c5 = arith.constant 5 : index
    %c0_17 = arith.constant 0 : index
    %36 = vector.load %arg5[%c5, %c0_17] : memref<18x128xf32, #tpu.memory_space<vmem>>, vector<1x128xf32>
    %37 = vector.broadcast %36 : vector<1x128xf32> to vector<8x128xf32>
    %38 = arith.mulf %35, %37 : vector<8x128xf32>
    %c121_i32 = arith.constant 121 : i32
    %39 = tpu.dynamic_rotate %18 by %c121_i32 dim 1 : vector<8x128xf32>, i32 -> vector<8x128xf32>
    %c6 = arith.constant 6 : index
    %c0_18 = arith.constant 0 : index
    %40 = vector.load %arg5[%c6, %c0_18] : memref<18x128xf32, #tpu.memory_space<vmem>>, vector<1x128xf32>
    %41 = vector.broadcast %40 : vector<1x128xf32> to vector<8x128xf32>
    %42 = arith.mulf %39, %41 : vector<8x128xf32>
    %c120_i32 = arith.constant 120 : i32
    %43 = tpu.dynamic_rotate %18 by %c120_i32 dim 1 : vector<8x128xf32>, i32 -> vector<8x128xf32>
    %c7 = arith.constant 7 : index
    %c0_19 = arith.constant 0 : index
    %44 = vector.load %arg5[%c7, %c0_19] : memref<18x128xf32, #tpu.memory_space<vmem>>, vector<1x128xf32>
    %45 = vector.broadcast %44 : vector<1x128xf32> to vector<8x128xf32>
    %46 = arith.mulf %43, %45 : vector<8x128xf32>
    %c119_i32 = arith.constant 119 : i32
    %47 = tpu.dynamic_rotate %18 by %c119_i32 dim 1 : vector<8x128xf32>, i32 -> vector<8x128xf32>
    %c8 = arith.constant 8 : index
    %c0_20 = arith.constant 0 : index
    %48 = vector.load %arg5[%c8, %c0_20] : memref<18x128xf32, #tpu.memory_space<vmem>>, vector<1x128xf32>
    %49 = vector.broadcast %48 : vector<1x128xf32> to vector<8x128xf32>
    %50 = arith.mulf %47, %49 : vector<8x128xf32>
    %c0_21 = arith.constant 0 : index
    %c0_22 = arith.constant 0 : index
    %51 = vector.load %arg6[%c0_21, %c0_22] : memref<40x10xf32, #tpu.memory_space<vmem>>, vector<8x1xf32>
    %52 = vector.broadcast %51 : vector<8x1xf32> to vector<8x128xf32>
    %53 = arith.mulf %52, %22 : vector<8x128xf32>
    %c0_23 = arith.constant 0 : index
    %c1_24 = arith.constant 1 : index
    %54 = vector.load %arg6[%c0_23, %c1_24] : memref<40x10xf32, #tpu.memory_space<vmem>>, vector<8x1xf32>
    %55 = vector.broadcast %54 : vector<8x1xf32> to vector<8x128xf32>
    %56 = arith.mulf %55, %26 : vector<8x128xf32>
    %57 = arith.addf %53, %56 : vector<8x128xf32>
    %c0_25 = arith.constant 0 : index
    %c2_26 = arith.constant 2 : index
    %58 = vector.load %arg6[%c0_25, %c2_26] : memref<40x10xf32, #tpu.memory_space<vmem>>, vector<8x1xf32>
    %59 = vector.broadcast %58 : vector<8x1xf32> to vector<8x128xf32>
    %60 = arith.mulf %59, %30 : vector<8x128xf32>
    %61 = arith.addf %57, %60 : vector<8x128xf32>
    %c0_27 = arith.constant 0 : index
    %c3_28 = arith.constant 3 : index
    %62 = vector.load %arg6[%c0_27, %c3_28] : memref<40x10xf32, #tpu.memory_space<vmem>>, vector<8x1xf32>
    %63 = vector.broadcast %62 : vector<8x1xf32> to vector<8x128xf32>
    %64 = arith.mulf %63, %34 : vector<8x128xf32>
    %65 = arith.addf %61, %64 : vector<8x128xf32>
    %c0_29 = arith.constant 0 : index
    %c4 = arith.constant 4 : index
    %66 = vector.load %arg6[%c0_29, %c4] : memref<40x10xf32, #tpu.memory_space<vmem>>, vector<8x1xf32>
    %67 = vector.broadcast %66 : vector<8x1xf32> to vector<8x128xf32>
    %68 = arith.mulf %67, %18 : vector<8x128xf32>
    %69 = arith.addf %65, %68 : vector<8x128xf32>
    %c0_30 = arith.constant 0 : index
    %c5_31 = arith.constant 5 : index
    %70 = vector.load %arg6[%c0_30, %c5_31] : memref<40x10xf32, #tpu.memory_space<vmem>>, vector<8x1xf32>
    %71 = vector.broadcast %70 : vector<8x1xf32> to vector<8x128xf32>
    %72 = arith.mulf %71, %38 : vector<8x128xf32>
    %73 = arith.addf %69, %72 : vector<8x128xf32>
    %c0_32 = arith.constant 0 : index
    %c6_33 = arith.constant 6 : index
    %74 = vector.load %arg6[%c0_32, %c6_33] : memref<40x10xf32, #tpu.memory_space<vmem>>, vector<8x1xf32>
    %75 = vector.broadcast %74 : vector<8x1xf32> to vector<8x128xf32>
    %76 = arith.mulf %75, %42 : vector<8x128xf32>
    %77 = arith.addf %73, %76 : vector<8x128xf32>
    %c0_34 = arith.constant 0 : index
    %c7_35 = arith.constant 7 : index
    %78 = vector.load %arg6[%c0_34, %c7_35] : memref<40x10xf32, #tpu.memory_space<vmem>>, vector<8x1xf32>
    %79 = vector.broadcast %78 : vector<8x1xf32> to vector<8x128xf32>
    %80 = arith.mulf %79, %46 : vector<8x128xf32>
    %81 = arith.addf %77, %80 : vector<8x128xf32>
    %c0_36 = arith.constant 0 : index
    %c8_37 = arith.constant 8 : index
    %82 = vector.load %arg6[%c0_36, %c8_37] : memref<40x10xf32, #tpu.memory_space<vmem>>, vector<8x1xf32>
    %83 = vector.broadcast %82 : vector<8x1xf32> to vector<8x128xf32>
    %84 = arith.mulf %83, %50 : vector<8x128xf32>
    %85 = arith.addf %81, %84 : vector<8x128xf32>
    %cst_38 = arith.constant 0.000000e+00 : f32
    %86 = vector.broadcast %cst_38 : f32 to vector<8x128xf32>
    %87 = arith.maximumf %16, %86 : vector<8x128xf32>
    %c9_i32_39 = arith.constant 9 : i32
    %88 = tpu.dynamic_rotate %87 by %c9_i32_39 dim 1 : vector<8x128xf32>, i32 -> vector<8x128xf32>
    %c0_40 = arith.constant 0 : index
    %c0_41 = arith.constant 0 : index
    %89 = vector.load %arg5[%c0_40, %c0_41] : memref<18x128xf32, #tpu.memory_space<vmem>>, vector<1x128xf32>
    %90 = vector.broadcast %89 : vector<1x128xf32> to vector<8x128xf32>
    %91 = arith.mulf %88, %90 : vector<8x128xf32>
    %c8_i32_42 = arith.constant 8 : i32
    %92 = tpu.dynamic_rotate %87 by %c8_i32_42 dim 1 : vector<8x128xf32>, i32 -> vector<8x128xf32>
    %c1_43 = arith.constant 1 : index
    %c0_44 = arith.constant 0 : index
    %93 = vector.load %arg5[%c1_43, %c0_44] : memref<18x128xf32, #tpu.memory_space<vmem>>, vector<1x128xf32>
    %94 = vector.broadcast %93 : vector<1x128xf32> to vector<8x128xf32>
    %95 = arith.mulf %92, %94 : vector<8x128xf32>
    %c7_i32_45 = arith.constant 7 : i32
    %96 = tpu.dynamic_rotate %87 by %c7_i32_45 dim 1 : vector<8x128xf32>, i32 -> vector<8x128xf32>
    %c2_46 = arith.constant 2 : index
    %c0_47 = arith.constant 0 : index
    %97 = vector.load %arg5[%c2_46, %c0_47] : memref<18x128xf32, #tpu.memory_space<vmem>>, vector<1x128xf32>
    %98 = vector.broadcast %97 : vector<1x128xf32> to vector<8x128xf32>
    %99 = arith.mulf %96, %98 : vector<8x128xf32>
    %c1_i32_48 = arith.constant 1 : i32
    %100 = tpu.dynamic_rotate %87 by %c1_i32_48 dim 1 : vector<8x128xf32>, i32 -> vector<8x128xf32>
    %c3_49 = arith.constant 3 : index
    %c0_50 = arith.constant 0 : index
    %101 = vector.load %arg5[%c3_49, %c0_50] : memref<18x128xf32, #tpu.memory_space<vmem>>, vector<1x128xf32>
    %102 = vector.broadcast %101 : vector<1x128xf32> to vector<8x128xf32>
    %103 = arith.mulf %100, %102 : vector<8x128xf32>
    %c127_i32_51 = arith.constant 127 : i32
    %104 = tpu.dynamic_rotate %87 by %c127_i32_51 dim 1 : vector<8x128xf32>, i32 -> vector<8x128xf32>
    %c5_52 = arith.constant 5 : index
    %c0_53 = arith.constant 0 : index
    %105 = vector.load %arg5[%c5_52, %c0_53] : memref<18x128xf32, #tpu.memory_space<vmem>>, vector<1x128xf32>
    %106 = vector.broadcast %105 : vector<1x128xf32> to vector<8x128xf32>
    %107 = arith.mulf %104, %106 : vector<8x128xf32>
    %c121_i32_54 = arith.constant 121 : i32
    %108 = tpu.dynamic_rotate %87 by %c121_i32_54 dim 1 : vector<8x128xf32>, i32 -> vector<8x128xf32>
    %c6_55 = arith.constant 6 : index
    %c0_56 = arith.constant 0 : index
    %109 = vector.load %arg5[%c6_55, %c0_56] : memref<18x128xf32, #tpu.memory_space<vmem>>, vector<1x128xf32>
    %110 = vector.broadcast %109 : vector<1x128xf32> to vector<8x128xf32>
    %111 = arith.mulf %108, %110 : vector<8x128xf32>
    %c120_i32_57 = arith.constant 120 : i32
    %112 = tpu.dynamic_rotate %87 by %c120_i32_57 dim 1 : vector<8x128xf32>, i32 -> vector<8x128xf32>
    %c7_58 = arith.constant 7 : index
    %c0_59 = arith.constant 0 : index
    %113 = vector.load %arg5[%c7_58, %c0_59] : memref<18x128xf32, #tpu.memory_space<vmem>>, vector<1x128xf32>
    %114 = vector.broadcast %113 : vector<1x128xf32> to vector<8x128xf32>
    %115 = arith.mulf %112, %114 : vector<8x128xf32>
    %c119_i32_60 = arith.constant 119 : i32
    %116 = tpu.dynamic_rotate %87 by %c119_i32_60 dim 1 : vector<8x128xf32>, i32 -> vector<8x128xf32>
    %c8_61 = arith.constant 8 : index
    %c0_62 = arith.constant 0 : index
    %117 = vector.load %arg5[%c8_61, %c0_62] : memref<18x128xf32, #tpu.memory_space<vmem>>, vector<1x128xf32>
    %118 = vector.broadcast %117 : vector<1x128xf32> to vector<8x128xf32>
    %119 = arith.mulf %116, %118 : vector<8x128xf32>
    %c8_63 = arith.constant 8 : index
    %c0_64 = arith.constant 0 : index
    %120 = vector.load %arg6[%c8_63, %c0_64] : memref<40x10xf32, #tpu.memory_space<vmem>>, vector<8x1xf32>
    %121 = vector.broadcast %120 : vector<8x1xf32> to vector<8x128xf32>
    %122 = arith.mulf %121, %91 : vector<8x128xf32>
    %c8_65 = arith.constant 8 : index
    %c1_66 = arith.constant 1 : index
    %123 = vector.load %arg6[%c8_65, %c1_66] : memref<40x10xf32, #tpu.memory_space<vmem>>, vector<8x1xf32>
    %124 = vector.broadcast %123 : vector<8x1xf32> to vector<8x128xf32>
    %125 = arith.mulf %124, %95 : vector<8x128xf32>
    %126 = arith.addf %122, %125 : vector<8x128xf32>
    %c8_67 = arith.constant 8 : index
    %c2_68 = arith.constant 2 : index
    %127 = vector.load %arg6[%c8_67, %c2_68] : memref<40x10xf32, #tpu.memory_space<vmem>>, vector<8x1xf32>
    %128 = vector.broadcast %127 : vector<8x1xf32> to vector<8x128xf32>
    %129 = arith.mulf %128, %99 : vector<8x128xf32>
    %130 = arith.addf %126, %129 : vector<8x128xf32>
    %c8_69 = arith.constant 8 : index
    %c3_70 = arith.constant 3 : index
    %131 = vector.load %arg6[%c8_69, %c3_70] : memref<40x10xf32, #tpu.memory_space<vmem>>, vector<8x1xf32>
    %132 = vector.broadcast %131 : vector<8x1xf32> to vector<8x128xf32>
    %133 = arith.mulf %132, %103 : vector<8x128xf32>
    %134 = arith.addf %130, %133 : vector<8x128xf32>
    %c8_71 = arith.constant 8 : index
    %c4_72 = arith.constant 4 : index
    %135 = vector.load %arg6[%c8_71, %c4_72] : memref<40x10xf32, #tpu.memory_space<vmem>>, vector<8x1xf32>
    %136 = vector.broadcast %135 : vector<8x1xf32> to vector<8x128xf32>
    %137 = arith.mulf %136, %87 : vector<8x128xf32>
    %138 = arith.addf %134, %137 : vector<8x128xf32>
    %c8_73 = arith.constant 8 : index
    %c5_74 = arith.constant 5 : index
    %139 = vector.load %arg6[%c8_73, %c5_74] : memref<40x10xf32, #tpu.memory_space<vmem>>, vector<8x1xf32>
    %140 = vector.broadcast %139 : vector<8x1xf32> to vector<8x128xf32>
    %141 = arith.mulf %140, %107 : vector<8x128xf32>
    %142 = arith.addf %138, %141 : vector<8x128xf32>
    %c8_75 = arith.constant 8 : index
    %c6_76 = arith.constant 6 : index
    %143 = vector.load %arg6[%c8_75, %c6_76] : memref<40x10xf32, #tpu.memory_space<vmem>>, vector<8x1xf32>
    %144 = vector.broadcast %143 : vector<8x1xf32> to vector<8x128xf32>
    %145 = arith.mulf %144, %111 : vector<8x128xf32>
    %146 = arith.addf %142, %145 : vector<8x128xf32>
    %c8_77 = arith.constant 8 : index
    %c7_78 = arith.constant 7 : index
    %147 = vector.load %arg6[%c8_77, %c7_78] : memref<40x10xf32, #tpu.memory_space<vmem>>, vector<8x1xf32>
    %148 = vector.broadcast %147 : vector<8x1xf32> to vector<8x128xf32>
    %149 = arith.mulf %148, %115 : vector<8x128xf32>
    %150 = arith.addf %146, %149 : vector<8x128xf32>
    %c8_79 = arith.constant 8 : index
    %c8_80 = arith.constant 8 : index
    %151 = vector.load %arg6[%c8_79, %c8_80] : memref<40x10xf32, #tpu.memory_space<vmem>>, vector<8x1xf32>
    %152 = vector.broadcast %151 : vector<8x1xf32> to vector<8x128xf32>
    %153 = arith.mulf %152, %119 : vector<8x128xf32>
    %154 = arith.addf %150, %153 : vector<8x128xf32>
    %c16 = arith.constant 16 : index
    %c0_81 = arith.constant 0 : index
    %155 = vector.load %arg6[%c16, %c0_81] : memref<40x10xf32, #tpu.memory_space<vmem>>, vector<8x1xf32>
    %156 = vector.broadcast %155 : vector<8x1xf32> to vector<8x128xf32>
    %157 = arith.mulf %156, %22 : vector<8x128xf32>
    %c16_82 = arith.constant 16 : index
    %c1_83 = arith.constant 1 : index
    %158 = vector.load %arg6[%c16_82, %c1_83] : memref<40x10xf32, #tpu.memory_space<vmem>>, vector<8x1xf32>
    %159 = vector.broadcast %158 : vector<8x1xf32> to vector<8x128xf32>
    %160 = arith.mulf %159, %26 : vector<8x128xf32>
    %161 = arith.addf %157, %160 : vector<8x128xf32>
    %c16_84 = arith.constant 16 : index
    %c2_85 = arith.constant 2 : index
    %162 = vector.load %arg6[%c16_84, %c2_85] : memref<40x10xf32, #tpu.memory_space<vmem>>, vector<8x1xf32>
    %163 = vector.broadcast %162 : vector<8x1xf32> to vector<8x128xf32>
    %164 = arith.mulf %163, %30 : vector<8x128xf32>
    %165 = arith.addf %161, %164 : vector<8x128xf32>
    %c16_86 = arith.constant 16 : index
    %c3_87 = arith.constant 3 : index
    %166 = vector.load %arg6[%c16_86, %c3_87] : memref<40x10xf32, #tpu.memory_space<vmem>>, vector<8x1xf32>
    %167 = vector.broadcast %166 : vector<8x1xf32> to vector<8x128xf32>
    %168 = arith.mulf %167, %34 : vector<8x128xf32>
    %169 = arith.addf %165, %168 : vector<8x128xf32>
    %c16_88 = arith.constant 16 : index
    %c4_89 = arith.constant 4 : index
    %170 = vector.load %arg6[%c16_88, %c4_89] : memref<40x10xf32, #tpu.memory_space<vmem>>, vector<8x1xf32>
    %171 = vector.broadcast %170 : vector<8x1xf32> to vector<8x128xf32>
    %172 = arith.mulf %171, %18 : vector<8x128xf32>
    %173 = arith.addf %169, %172 : vector<8x128xf32>
    %c16_90 = arith.constant 16 : index
    %c5_91 = arith.constant 5 : index
    %174 = vector.load %arg6[%c16_90, %c5_91] : memref<40x10xf32, #tpu.memory_space<vmem>>, vector<8x1xf32>
    %175 = vector.broadcast %174 : vector<8x1xf32> to vector<8x128xf32>
    %176 = arith.mulf %175, %38 : vector<8x128xf32>
    %177 = arith.addf %173, %176 : vector<8x128xf32>
    %c16_92 = arith.constant 16 : index
    %c6_93 = arith.constant 6 : index
    %178 = vector.load %arg6[%c16_92, %c6_93] : memref<40x10xf32, #tpu.memory_space<vmem>>, vector<8x1xf32>
    %179 = vector.broadcast %178 : vector<8x1xf32> to vector<8x128xf32>
    %180 = arith.mulf %179, %42 : vector<8x128xf32>
    %181 = arith.addf %177, %180 : vector<8x128xf32>
    %c16_94 = arith.constant 16 : index
    %c7_95 = arith.constant 7 : index
    %182 = vector.load %arg6[%c16_94, %c7_95] : memref<40x10xf32, #tpu.memory_space<vmem>>, vector<8x1xf32>
    %183 = vector.broadcast %182 : vector<8x1xf32> to vector<8x128xf32>
    %184 = arith.mulf %183, %46 : vector<8x128xf32>
    %185 = arith.addf %181, %184 : vector<8x128xf32>
    %c16_96 = arith.constant 16 : index
    %c8_97 = arith.constant 8 : index
    %186 = vector.load %arg6[%c16_96, %c8_97] : memref<40x10xf32, #tpu.memory_space<vmem>>, vector<8x1xf32>
    %187 = vector.broadcast %186 : vector<8x1xf32> to vector<8x128xf32>
    %188 = arith.mulf %187, %50 : vector<8x128xf32>
    %189 = arith.addf %185, %188 : vector<8x128xf32>
    %c24 = arith.constant 24 : index
    %c0_98 = arith.constant 0 : index
    %190 = vector.load %arg6[%c24, %c0_98] : memref<40x10xf32, #tpu.memory_space<vmem>>, vector<8x1xf32>
    %191 = vector.broadcast %190 : vector<8x1xf32> to vector<8x128xf32>
    %192 = arith.mulf %191, %91 : vector<8x128xf32>
    %c24_99 = arith.constant 24 : index
    %c1_100 = arith.constant 1 : index
    %193 = vector.load %arg6[%c24_99, %c1_100] : memref<40x10xf32, #tpu.memory_space<vmem>>, vector<8x1xf32>
    %194 = vector.broadcast %193 : vector<8x1xf32> to vector<8x128xf32>
    %195 = arith.mulf %194, %95 : vector<8x128xf32>
    %196 = arith.addf %192, %195 : vector<8x128xf32>
    %c24_101 = arith.constant 24 : index
    %c2_102 = arith.constant 2 : index
    %197 = vector.load %arg6[%c24_101, %c2_102] : memref<40x10xf32, #tpu.memory_space<vmem>>, vector<8x1xf32>
    %198 = vector.broadcast %197 : vector<8x1xf32> to vector<8x128xf32>
    %199 = arith.mulf %198, %99 : vector<8x128xf32>
    %200 = arith.addf %196, %199 : vector<8x128xf32>
    %c24_103 = arith.constant 24 : index
    %c3_104 = arith.constant 3 : index
    %201 = vector.load %arg6[%c24_103, %c3_104] : memref<40x10xf32, #tpu.memory_space<vmem>>, vector<8x1xf32>
    %202 = vector.broadcast %201 : vector<8x1xf32> to vector<8x128xf32>
    %203 = arith.mulf %202, %103 : vector<8x128xf32>
    %204 = arith.addf %200, %203 : vector<8x128xf32>
    %c24_105 = arith.constant 24 : index
    %c4_106 = arith.constant 4 : index
    %205 = vector.load %arg6[%c24_105, %c4_106] : memref<40x10xf32, #tpu.memory_space<vmem>>, vector<8x1xf32>
    %206 = vector.broadcast %205 : vector<8x1xf32> to vector<8x128xf32>
    %207 = arith.mulf %206, %87 : vector<8x128xf32>
    %208 = arith.addf %204, %207 : vector<8x128xf32>
    %c24_107 = arith.constant 24 : index
    %c5_108 = arith.constant 5 : index
    %209 = vector.load %arg6[%c24_107, %c5_108] : memref<40x10xf32, #tpu.memory_space<vmem>>, vector<8x1xf32>
    %210 = vector.broadcast %209 : vector<8x1xf32> to vector<8x128xf32>
    %211 = arith.mulf %210, %107 : vector<8x128xf32>
    %212 = arith.addf %208, %211 : vector<8x128xf32>
    %c24_109 = arith.constant 24 : index
    %c6_110 = arith.constant 6 : index
    %213 = vector.load %arg6[%c24_109, %c6_110] : memref<40x10xf32, #tpu.memory_space<vmem>>, vector<8x1xf32>
    %214 = vector.broadcast %213 : vector<8x1xf32> to vector<8x128xf32>
    %215 = arith.mulf %214, %111 : vector<8x128xf32>
    %216 = arith.addf %212, %215 : vector<8x128xf32>
    %c24_111 = arith.constant 24 : index
    %c7_112 = arith.constant 7 : index
    %217 = vector.load %arg6[%c24_111, %c7_112] : memref<40x10xf32, #tpu.memory_space<vmem>>, vector<8x1xf32>
    %218 = vector.broadcast %217 : vector<8x1xf32> to vector<8x128xf32>
    %219 = arith.mulf %218, %115 : vector<8x128xf32>
    %220 = arith.addf %216, %219 : vector<8x128xf32>
    %c24_113 = arith.constant 24 : index
    %c8_114 = arith.constant 8 : index
    %221 = vector.load %arg6[%c24_113, %c8_114] : memref<40x10xf32, #tpu.memory_space<vmem>>, vector<8x1xf32>
    %222 = vector.broadcast %221 : vector<8x1xf32> to vector<8x128xf32>
    %223 = arith.mulf %222, %119 : vector<8x128xf32>
    %224 = arith.addf %220, %223 : vector<8x128xf32>
    %c32 = arith.constant 32 : index
    %c0_115 = arith.constant 0 : index
    %225 = vector.load %arg6[%c32, %c0_115] : memref<40x10xf32, #tpu.memory_space<vmem>>, vector<8x1xf32>
    %226 = vector.broadcast %225 : vector<8x1xf32> to vector<8x128xf32>
    %227 = arith.mulf %226, %91 : vector<8x128xf32>
    %c32_116 = arith.constant 32 : index
    %c1_117 = arith.constant 1 : index
    %228 = vector.load %arg6[%c32_116, %c1_117] : memref<40x10xf32, #tpu.memory_space<vmem>>, vector<8x1xf32>
    %229 = vector.broadcast %228 : vector<8x1xf32> to vector<8x128xf32>
    %230 = arith.mulf %229, %95 : vector<8x128xf32>
    %231 = arith.addf %227, %230 : vector<8x128xf32>
    %c32_118 = arith.constant 32 : index
    %c2_119 = arith.constant 2 : index
    %232 = vector.load %arg6[%c32_118, %c2_119] : memref<40x10xf32, #tpu.memory_space<vmem>>, vector<8x1xf32>
    %233 = vector.broadcast %232 : vector<8x1xf32> to vector<8x128xf32>
    %234 = arith.mulf %233, %99 : vector<8x128xf32>
    %235 = arith.addf %231, %234 : vector<8x128xf32>
    %c32_120 = arith.constant 32 : index
    %c3_121 = arith.constant 3 : index
    %236 = vector.load %arg6[%c32_120, %c3_121] : memref<40x10xf32, #tpu.memory_space<vmem>>, vector<8x1xf32>
    %237 = vector.broadcast %236 : vector<8x1xf32> to vector<8x128xf32>
    %238 = arith.mulf %237, %103 : vector<8x128xf32>
    %239 = arith.addf %235, %238 : vector<8x128xf32>
    %c32_122 = arith.constant 32 : index
    %c4_123 = arith.constant 4 : index
    %240 = vector.load %arg6[%c32_122, %c4_123] : memref<40x10xf32, #tpu.memory_space<vmem>>, vector<8x1xf32>
    %241 = vector.broadcast %240 : vector<8x1xf32> to vector<8x128xf32>
    %242 = arith.mulf %241, %87 : vector<8x128xf32>
    %243 = arith.addf %239, %242 : vector<8x128xf32>
    %c32_124 = arith.constant 32 : index
    %c5_125 = arith.constant 5 : index
    %244 = vector.load %arg6[%c32_124, %c5_125] : memref<40x10xf32, #tpu.memory_space<vmem>>, vector<8x1xf32>
    %245 = vector.broadcast %244 : vector<8x1xf32> to vector<8x128xf32>
    %246 = arith.mulf %245, %107 : vector<8x128xf32>
    %247 = arith.addf %243, %246 : vector<8x128xf32>
    %c32_126 = arith.constant 32 : index
    %c6_127 = arith.constant 6 : index
    %248 = vector.load %arg6[%c32_126, %c6_127] : memref<40x10xf32, #tpu.memory_space<vmem>>, vector<8x1xf32>
    %249 = vector.broadcast %248 : vector<8x1xf32> to vector<8x128xf32>
    %250 = arith.mulf %249, %111 : vector<8x128xf32>
    %251 = arith.addf %247, %250 : vector<8x128xf32>
    %c32_128 = arith.constant 32 : index
    %c7_129 = arith.constant 7 : index
    %252 = vector.load %arg6[%c32_128, %c7_129] : memref<40x10xf32, #tpu.memory_space<vmem>>, vector<8x1xf32>
    %253 = vector.broadcast %252 : vector<8x1xf32> to vector<8x128xf32>
    %254 = arith.mulf %253, %115 : vector<8x128xf32>
    %255 = arith.addf %251, %254 : vector<8x128xf32>
    %c32_130 = arith.constant 32 : index
    %c8_131 = arith.constant 8 : index
    %256 = vector.load %arg6[%c32_130, %c8_131] : memref<40x10xf32, #tpu.memory_space<vmem>>, vector<8x1xf32>
    %257 = vector.broadcast %256 : vector<8x1xf32> to vector<8x128xf32>
    %258 = arith.mulf %257, %119 : vector<8x128xf32>
    %259 = arith.addf %255, %258 : vector<8x128xf32>
    %260 = tpu.concatenate %85, %154, %189, %224, %259 in 0 : vector<8x128xf32>, vector<8x128xf32>, vector<8x128xf32>, vector<8x128xf32>, vector<8x128xf32> -> vector<40x128xf32>
    %c0_132 = arith.constant 0 : index
    %c0_133 = arith.constant 0 : index
    %261 = vector.load %arg9[%c0_132, %c0_133] : memref<40x40xbf16, #tpu.memory_space<vmem>>, vector<40x40xbf16>
    %262 = arith.truncf %260 : vector<40x128xf32> to vector<40x128xbf16>
    %cst_134 = arith.constant dense<0.000000e+00> : vector<40x128xf32>
    %263 = tpu.matmul %261, %262, %cst_134 {dimension_numbers = #tpu.dot_dimension_numbers<[1], [0], [0], [1], [0, 0, 1, 1], [], []>} : vector<40x40xbf16>, vector<40x128xbf16>, vector<40x128xf32> -> vector<40x128xf32>
    %c0_135 = arith.constant 0 : index
    %c9 = arith.constant 9 : index
    %264 = vector.load %arg6[%c0_135, %c9] : memref<40x10xf32, #tpu.memory_space<vmem>>, vector<40x1xf32>
    %265 = vector.broadcast %264 : vector<40x1xf32> to vector<40x128xf32>
    %266 = arith.addf %263, %265 : vector<40x128xf32>
    %267 = vector.extract_strided_slice %266 {offsets = [0, 0], sizes = [8, 128], strides = [1, 1]} : vector<40x128xf32> to vector<8x128xf32>
    %268 = vector.extract_strided_slice %266 {offsets = [8, 0], sizes = [8, 128], strides = [1, 1]} : vector<40x128xf32> to vector<8x128xf32>
    %269 = vector.extract_strided_slice %266 {offsets = [16, 0], sizes = [8, 128], strides = [1, 1]} : vector<40x128xf32> to vector<8x128xf32>
    %270 = vector.extract_strided_slice %266 {offsets = [24, 0], sizes = [8, 128], strides = [1, 1]} : vector<40x128xf32> to vector<8x128xf32>
    %271 = vector.extract_strided_slice %266 {offsets = [32, 0], sizes = [8, 128], strides = [1, 1]} : vector<40x128xf32> to vector<8x128xf32>
    %cst_136 = arith.constant 0.000000e+00 : f32
    %272 = vector.broadcast %cst_136 : f32 to vector<8x128xf32>
    %273 = arith.maximumf %267, %272 : vector<8x128xf32>
    %c9_i32_137 = arith.constant 9 : i32
    %274 = tpu.dynamic_rotate %273 by %c9_i32_137 dim 1 : vector<8x128xf32>, i32 -> vector<8x128xf32>
    %c0_138 = arith.constant 0 : index
    %c0_139 = arith.constant 0 : index
    %275 = vector.load %arg5[%c0_138, %c0_139] : memref<18x128xf32, #tpu.memory_space<vmem>>, vector<1x128xf32>
    %276 = vector.broadcast %275 : vector<1x128xf32> to vector<8x128xf32>
    %277 = arith.mulf %274, %276 : vector<8x128xf32>
    %c8_i32_140 = arith.constant 8 : i32
    %278 = tpu.dynamic_rotate %273 by %c8_i32_140 dim 1 : vector<8x128xf32>, i32 -> vector<8x128xf32>
    %c1_141 = arith.constant 1 : index
    %c0_142 = arith.constant 0 : index
    %279 = vector.load %arg5[%c1_141, %c0_142] : memref<18x128xf32, #tpu.memory_space<vmem>>, vector<1x128xf32>
    %280 = vector.broadcast %279 : vector<1x128xf32> to vector<8x128xf32>
    %281 = arith.mulf %278, %280 : vector<8x128xf32>
    %c7_i32_143 = arith.constant 7 : i32
    %282 = tpu.dynamic_rotate %273 by %c7_i32_143 dim 1 : vector<8x128xf32>, i32 -> vector<8x128xf32>
    %c2_144 = arith.constant 2 : index
    %c0_145 = arith.constant 0 : index
    %283 = vector.load %arg5[%c2_144, %c0_145] : memref<18x128xf32, #tpu.memory_space<vmem>>, vector<1x128xf32>
    %284 = vector.broadcast %283 : vector<1x128xf32> to vector<8x128xf32>
    %285 = arith.mulf %282, %284 : vector<8x128xf32>
    %c1_i32_146 = arith.constant 1 : i32
    %286 = tpu.dynamic_rotate %273 by %c1_i32_146 dim 1 : vector<8x128xf32>, i32 -> vector<8x128xf32>
    %c3_147 = arith.constant 3 : index
    %c0_148 = arith.constant 0 : index
    %287 = vector.load %arg5[%c3_147, %c0_148] : memref<18x128xf32, #tpu.memory_space<vmem>>, vector<1x128xf32>
    %288 = vector.broadcast %287 : vector<1x128xf32> to vector<8x128xf32>
    %289 = arith.mulf %286, %288 : vector<8x128xf32>
    %c127_i32_149 = arith.constant 127 : i32
    %290 = tpu.dynamic_rotate %273 by %c127_i32_149 dim 1 : vector<8x128xf32>, i32 -> vector<8x128xf32>
    %c5_150 = arith.constant 5 : index
    %c0_151 = arith.constant 0 : index
    %291 = vector.load %arg5[%c5_150, %c0_151] : memref<18x128xf32, #tpu.memory_space<vmem>>, vector<1x128xf32>
    %292 = vector.broadcast %291 : vector<1x128xf32> to vector<8x128xf32>
    %293 = arith.mulf %290, %292 : vector<8x128xf32>
    %c121_i32_152 = arith.constant 121 : i32
    %294 = tpu.dynamic_rotate %273 by %c121_i32_152 dim 1 : vector<8x128xf32>, i32 -> vector<8x128xf32>
    %c6_153 = arith.constant 6 : index
    %c0_154 = arith.constant 0 : index
    %295 = vector.load %arg5[%c6_153, %c0_154] : memref<18x128xf32, #tpu.memory_space<vmem>>, vector<1x128xf32>
    %296 = vector.broadcast %295 : vector<1x128xf32> to vector<8x128xf32>
    %297 = arith.mulf %294, %296 : vector<8x128xf32>
    %c120_i32_155 = arith.constant 120 : i32
    %298 = tpu.dynamic_rotate %273 by %c120_i32_155 dim 1 : vector<8x128xf32>, i32 -> vector<8x128xf32>
    %c7_156 = arith.constant 7 : index
    %c0_157 = arith.constant 0 : index
    %299 = vector.load %arg5[%c7_156, %c0_157] : memref<18x128xf32, #tpu.memory_space<vmem>>, vector<1x128xf32>
    %300 = vector.broadcast %299 : vector<1x128xf32> to vector<8x128xf32>
    %301 = arith.mulf %298, %300 : vector<8x128xf32>
    %c119_i32_158 = arith.constant 119 : i32
    %302 = tpu.dynamic_rotate %273 by %c119_i32_158 dim 1 : vector<8x128xf32>, i32 -> vector<8x128xf32>
    %c8_159 = arith.constant 8 : index
    %c0_160 = arith.constant 0 : index
    %303 = vector.load %arg5[%c8_159, %c0_160] : memref<18x128xf32, #tpu.memory_space<vmem>>, vector<1x128xf32>
    %304 = vector.broadcast %303 : vector<1x128xf32> to vector<8x128xf32>
    %305 = arith.mulf %302, %304 : vector<8x128xf32>
    %c0_161 = arith.constant 0 : index
    %c0_162 = arith.constant 0 : index
    %306 = vector.load %arg7[%c0_161, %c0_162] : memref<40x10xf32, #tpu.memory_space<vmem>>, vector<8x1xf32>
    %307 = vector.broadcast %306 : vector<8x1xf32> to vector<8x128xf32>
    %308 = arith.mulf %307, %277 : vector<8x128xf32>
    %c0_163 = arith.constant 0 : index
    %c1_164 = arith.constant 1 : index
    %309 = vector.load %arg7[%c0_163, %c1_164] : memref<40x10xf32, #tpu.memory_space<vmem>>, vector<8x1xf32>
    %310 = vector.broadcast %309 : vector<8x1xf32> to vector<8x128xf32>
    %311 = arith.mulf %310, %281 : vector<8x128xf32>
    %312 = arith.addf %308, %311 : vector<8x128xf32>
    %c0_165 = arith.constant 0 : index
    %c2_166 = arith.constant 2 : index
    %313 = vector.load %arg7[%c0_165, %c2_166] : memref<40x10xf32, #tpu.memory_space<vmem>>, vector<8x1xf32>
    %314 = vector.broadcast %313 : vector<8x1xf32> to vector<8x128xf32>
    %315 = arith.mulf %314, %285 : vector<8x128xf32>
    %316 = arith.addf %312, %315 : vector<8x128xf32>
    %c0_167 = arith.constant 0 : index
    %c3_168 = arith.constant 3 : index
    %317 = vector.load %arg7[%c0_167, %c3_168] : memref<40x10xf32, #tpu.memory_space<vmem>>, vector<8x1xf32>
    %318 = vector.broadcast %317 : vector<8x1xf32> to vector<8x128xf32>
    %319 = arith.mulf %318, %289 : vector<8x128xf32>
    %320 = arith.addf %316, %319 : vector<8x128xf32>
    %c0_169 = arith.constant 0 : index
    %c4_170 = arith.constant 4 : index
    %321 = vector.load %arg7[%c0_169, %c4_170] : memref<40x10xf32, #tpu.memory_space<vmem>>, vector<8x1xf32>
    %322 = vector.broadcast %321 : vector<8x1xf32> to vector<8x128xf32>
    %323 = arith.mulf %322, %273 : vector<8x128xf32>
    %324 = arith.addf %320, %323 : vector<8x128xf32>
    %c0_171 = arith.constant 0 : index
    %c5_172 = arith.constant 5 : index
    %325 = vector.load %arg7[%c0_171, %c5_172] : memref<40x10xf32, #tpu.memory_space<vmem>>, vector<8x1xf32>
    %326 = vector.broadcast %325 : vector<8x1xf32> to vector<8x128xf32>
    %327 = arith.mulf %326, %293 : vector<8x128xf32>
    %328 = arith.addf %324, %327 : vector<8x128xf32>
    %c0_173 = arith.constant 0 : index
    %c6_174 = arith.constant 6 : index
    %329 = vector.load %arg7[%c0_173, %c6_174] : memref<40x10xf32, #tpu.memory_space<vmem>>, vector<8x1xf32>
    %330 = vector.broadcast %329 : vector<8x1xf32> to vector<8x128xf32>
    %331 = arith.mulf %330, %297 : vector<8x128xf32>
    %332 = arith.addf %328, %331 : vector<8x128xf32>
    %c0_175 = arith.constant 0 : index
    %c7_176 = arith.constant 7 : index
    %333 = vector.load %arg7[%c0_175, %c7_176] : memref<40x10xf32, #tpu.memory_space<vmem>>, vector<8x1xf32>
    %334 = vector.broadcast %333 : vector<8x1xf32> to vector<8x128xf32>
    %335 = arith.mulf %334, %301 : vector<8x128xf32>
    %336 = arith.addf %332, %335 : vector<8x128xf32>
    %c0_177 = arith.constant 0 : index
    %c8_178 = arith.constant 8 : index
    %337 = vector.load %arg7[%c0_177, %c8_178] : memref<40x10xf32, #tpu.memory_space<vmem>>, vector<8x1xf32>
    %338 = vector.broadcast %337 : vector<8x1xf32> to vector<8x128xf32>
    %339 = arith.mulf %338, %305 : vector<8x128xf32>
    %340 = arith.addf %336, %339 : vector<8x128xf32>
    %cst_179 = arith.constant 0.000000e+00 : f32
    %341 = vector.broadcast %cst_179 : f32 to vector<8x128xf32>
    %342 = arith.maximumf %268, %341 : vector<8x128xf32>
    %c9_i32_180 = arith.constant 9 : i32
    %343 = tpu.dynamic_rotate %342 by %c9_i32_180 dim 1 : vector<8x128xf32>, i32 -> vector<8x128xf32>
    %c0_181 = arith.constant 0 : index
    %c0_182 = arith.constant 0 : index
    %344 = vector.load %arg5[%c0_181, %c0_182] : memref<18x128xf32, #tpu.memory_space<vmem>>, vector<1x128xf32>
    %345 = vector.broadcast %344 : vector<1x128xf32> to vector<8x128xf32>
    %346 = arith.mulf %343, %345 : vector<8x128xf32>
    %c8_i32_183 = arith.constant 8 : i32
    %347 = tpu.dynamic_rotate %342 by %c8_i32_183 dim 1 : vector<8x128xf32>, i32 -> vector<8x128xf32>
    %c1_184 = arith.constant 1 : index
    %c0_185 = arith.constant 0 : index
    %348 = vector.load %arg5[%c1_184, %c0_185] : memref<18x128xf32, #tpu.memory_space<vmem>>, vector<1x128xf32>
    %349 = vector.broadcast %348 : vector<1x128xf32> to vector<8x128xf32>
    %350 = arith.mulf %347, %349 : vector<8x128xf32>
    %c7_i32_186 = arith.constant 7 : i32
    %351 = tpu.dynamic_rotate %342 by %c7_i32_186 dim 1 : vector<8x128xf32>, i32 -> vector<8x128xf32>
    %c2_187 = arith.constant 2 : index
    %c0_188 = arith.constant 0 : index
    %352 = vector.load %arg5[%c2_187, %c0_188] : memref<18x128xf32, #tpu.memory_space<vmem>>, vector<1x128xf32>
    %353 = vector.broadcast %352 : vector<1x128xf32> to vector<8x128xf32>
    %354 = arith.mulf %351, %353 : vector<8x128xf32>
    %c1_i32_189 = arith.constant 1 : i32
    %355 = tpu.dynamic_rotate %342 by %c1_i32_189 dim 1 : vector<8x128xf32>, i32 -> vector<8x128xf32>
    %c3_190 = arith.constant 3 : index
    %c0_191 = arith.constant 0 : index
    %356 = vector.load %arg5[%c3_190, %c0_191] : memref<18x128xf32, #tpu.memory_space<vmem>>, vector<1x128xf32>
    %357 = vector.broadcast %356 : vector<1x128xf32> to vector<8x128xf32>
    %358 = arith.mulf %355, %357 : vector<8x128xf32>
    %c127_i32_192 = arith.constant 127 : i32
    %359 = tpu.dynamic_rotate %342 by %c127_i32_192 dim 1 : vector<8x128xf32>, i32 -> vector<8x128xf32>
    %c5_193 = arith.constant 5 : index
    %c0_194 = arith.constant 0 : index
    %360 = vector.load %arg5[%c5_193, %c0_194] : memref<18x128xf32, #tpu.memory_space<vmem>>, vector<1x128xf32>
    %361 = vector.broadcast %360 : vector<1x128xf32> to vector<8x128xf32>
    %362 = arith.mulf %359, %361 : vector<8x128xf32>
    %c121_i32_195 = arith.constant 121 : i32
    %363 = tpu.dynamic_rotate %342 by %c121_i32_195 dim 1 : vector<8x128xf32>, i32 -> vector<8x128xf32>
    %c6_196 = arith.constant 6 : index
    %c0_197 = arith.constant 0 : index
    %364 = vector.load %arg5[%c6_196, %c0_197] : memref<18x128xf32, #tpu.memory_space<vmem>>, vector<1x128xf32>
    %365 = vector.broadcast %364 : vector<1x128xf32> to vector<8x128xf32>
    %366 = arith.mulf %363, %365 : vector<8x128xf32>
    %c120_i32_198 = arith.constant 120 : i32
    %367 = tpu.dynamic_rotate %342 by %c120_i32_198 dim 1 : vector<8x128xf32>, i32 -> vector<8x128xf32>
    %c7_199 = arith.constant 7 : index
    %c0_200 = arith.constant 0 : index
    %368 = vector.load %arg5[%c7_199, %c0_200] : memref<18x128xf32, #tpu.memory_space<vmem>>, vector<1x128xf32>
    %369 = vector.broadcast %368 : vector<1x128xf32> to vector<8x128xf32>
    %370 = arith.mulf %367, %369 : vector<8x128xf32>
    %c119_i32_201 = arith.constant 119 : i32
    %371 = tpu.dynamic_rotate %342 by %c119_i32_201 dim 1 : vector<8x128xf32>, i32 -> vector<8x128xf32>
    %c8_202 = arith.constant 8 : index
    %c0_203 = arith.constant 0 : index
    %372 = vector.load %arg5[%c8_202, %c0_203] : memref<18x128xf32, #tpu.memory_space<vmem>>, vector<1x128xf32>
    %373 = vector.broadcast %372 : vector<1x128xf32> to vector<8x128xf32>
    %374 = arith.mulf %371, %373 : vector<8x128xf32>
    %c8_204 = arith.constant 8 : index
    %c0_205 = arith.constant 0 : index
    %375 = vector.load %arg7[%c8_204, %c0_205] : memref<40x10xf32, #tpu.memory_space<vmem>>, vector<8x1xf32>
    %376 = vector.broadcast %375 : vector<8x1xf32> to vector<8x128xf32>
    %377 = arith.mulf %376, %346 : vector<8x128xf32>
    %c8_206 = arith.constant 8 : index
    %c1_207 = arith.constant 1 : index
    %378 = vector.load %arg7[%c8_206, %c1_207] : memref<40x10xf32, #tpu.memory_space<vmem>>, vector<8x1xf32>
    %379 = vector.broadcast %378 : vector<8x1xf32> to vector<8x128xf32>
    %380 = arith.mulf %379, %350 : vector<8x128xf32>
    %381 = arith.addf %377, %380 : vector<8x128xf32>
    %c8_208 = arith.constant 8 : index
    %c2_209 = arith.constant 2 : index
    %382 = vector.load %arg7[%c8_208, %c2_209] : memref<40x10xf32, #tpu.memory_space<vmem>>, vector<8x1xf32>
    %383 = vector.broadcast %382 : vector<8x1xf32> to vector<8x128xf32>
    %384 = arith.mulf %383, %354 : vector<8x128xf32>
    %385 = arith.addf %381, %384 : vector<8x128xf32>
    %c8_210 = arith.constant 8 : index
    %c3_211 = arith.constant 3 : index
    %386 = vector.load %arg7[%c8_210, %c3_211] : memref<40x10xf32, #tpu.memory_space<vmem>>, vector<8x1xf32>
    %387 = vector.broadcast %386 : vector<8x1xf32> to vector<8x128xf32>
    %388 = arith.mulf %387, %358 : vector<8x128xf32>
    %389 = arith.addf %385, %388 : vector<8x128xf32>
    %c8_212 = arith.constant 8 : index
    %c4_213 = arith.constant 4 : index
    %390 = vector.load %arg7[%c8_212, %c4_213] : memref<40x10xf32, #tpu.memory_space<vmem>>, vector<8x1xf32>
    %391 = vector.broadcast %390 : vector<8x1xf32> to vector<8x128xf32>
    %392 = arith.mulf %391, %342 : vector<8x128xf32>
    %393 = arith.addf %389, %392 : vector<8x128xf32>
    %c8_214 = arith.constant 8 : index
    %c5_215 = arith.constant 5 : index
    %394 = vector.load %arg7[%c8_214, %c5_215] : memref<40x10xf32, #tpu.memory_space<vmem>>, vector<8x1xf32>
    %395 = vector.broadcast %394 : vector<8x1xf32> to vector<8x128xf32>
    %396 = arith.mulf %395, %362 : vector<8x128xf32>
    %397 = arith.addf %393, %396 : vector<8x128xf32>
    %c8_216 = arith.constant 8 : index
    %c6_217 = arith.constant 6 : index
    %398 = vector.load %arg7[%c8_216, %c6_217] : memref<40x10xf32, #tpu.memory_space<vmem>>, vector<8x1xf32>
    %399 = vector.broadcast %398 : vector<8x1xf32> to vector<8x128xf32>
    %400 = arith.mulf %399, %366 : vector<8x128xf32>
    %401 = arith.addf %397, %400 : vector<8x128xf32>
    %c8_218 = arith.constant 8 : index
    %c7_219 = arith.constant 7 : index
    %402 = vector.load %arg7[%c8_218, %c7_219] : memref<40x10xf32, #tpu.memory_space<vmem>>, vector<8x1xf32>
    %403 = vector.broadcast %402 : vector<8x1xf32> to vector<8x128xf32>
    %404 = arith.mulf %403, %370 : vector<8x128xf32>
    %405 = arith.addf %401, %404 : vector<8x128xf32>
    %c8_220 = arith.constant 8 : index
    %c8_221 = arith.constant 8 : index
    %406 = vector.load %arg7[%c8_220, %c8_221] : memref<40x10xf32, #tpu.memory_space<vmem>>, vector<8x1xf32>
    %407 = vector.broadcast %406 : vector<8x1xf32> to vector<8x128xf32>
    %408 = arith.mulf %407, %374 : vector<8x128xf32>
    %409 = arith.addf %405, %408 : vector<8x128xf32>
    %cst_222 = arith.constant 0.000000e+00 : f32
    %410 = vector.broadcast %cst_222 : f32 to vector<8x128xf32>
    %411 = arith.maximumf %269, %410 : vector<8x128xf32>
    %c9_i32_223 = arith.constant 9 : i32
    %412 = tpu.dynamic_rotate %411 by %c9_i32_223 dim 1 : vector<8x128xf32>, i32 -> vector<8x128xf32>
    %c0_224 = arith.constant 0 : index
    %c0_225 = arith.constant 0 : index
    %413 = vector.load %arg5[%c0_224, %c0_225] : memref<18x128xf32, #tpu.memory_space<vmem>>, vector<1x128xf32>
    %414 = vector.broadcast %413 : vector<1x128xf32> to vector<8x128xf32>
    %415 = arith.mulf %412, %414 : vector<8x128xf32>
    %c8_i32_226 = arith.constant 8 : i32
    %416 = tpu.dynamic_rotate %411 by %c8_i32_226 dim 1 : vector<8x128xf32>, i32 -> vector<8x128xf32>
    %c1_227 = arith.constant 1 : index
    %c0_228 = arith.constant 0 : index
    %417 = vector.load %arg5[%c1_227, %c0_228] : memref<18x128xf32, #tpu.memory_space<vmem>>, vector<1x128xf32>
    %418 = vector.broadcast %417 : vector<1x128xf32> to vector<8x128xf32>
    %419 = arith.mulf %416, %418 : vector<8x128xf32>
    %c7_i32_229 = arith.constant 7 : i32
    %420 = tpu.dynamic_rotate %411 by %c7_i32_229 dim 1 : vector<8x128xf32>, i32 -> vector<8x128xf32>
    %c2_230 = arith.constant 2 : index
    %c0_231 = arith.constant 0 : index
    %421 = vector.load %arg5[%c2_230, %c0_231] : memref<18x128xf32, #tpu.memory_space<vmem>>, vector<1x128xf32>
    %422 = vector.broadcast %421 : vector<1x128xf32> to vector<8x128xf32>
    %423 = arith.mulf %420, %422 : vector<8x128xf32>
    %c1_i32_232 = arith.constant 1 : i32
    %424 = tpu.dynamic_rotate %411 by %c1_i32_232 dim 1 : vector<8x128xf32>, i32 -> vector<8x128xf32>
    %c3_233 = arith.constant 3 : index
    %c0_234 = arith.constant 0 : index
    %425 = vector.load %arg5[%c3_233, %c0_234] : memref<18x128xf32, #tpu.memory_space<vmem>>, vector<1x128xf32>
    %426 = vector.broadcast %425 : vector<1x128xf32> to vector<8x128xf32>
    %427 = arith.mulf %424, %426 : vector<8x128xf32>
    %c127_i32_235 = arith.constant 127 : i32
    %428 = tpu.dynamic_rotate %411 by %c127_i32_235 dim 1 : vector<8x128xf32>, i32 -> vector<8x128xf32>
    %c5_236 = arith.constant 5 : index
    %c0_237 = arith.constant 0 : index
    %429 = vector.load %arg5[%c5_236, %c0_237] : memref<18x128xf32, #tpu.memory_space<vmem>>, vector<1x128xf32>
    %430 = vector.broadcast %429 : vector<1x128xf32> to vector<8x128xf32>
    %431 = arith.mulf %428, %430 : vector<8x128xf32>
    %c121_i32_238 = arith.constant 121 : i32
    %432 = tpu.dynamic_rotate %411 by %c121_i32_238 dim 1 : vector<8x128xf32>, i32 -> vector<8x128xf32>
    %c6_239 = arith.constant 6 : index
    %c0_240 = arith.constant 0 : index
    %433 = vector.load %arg5[%c6_239, %c0_240] : memref<18x128xf32, #tpu.memory_space<vmem>>, vector<1x128xf32>
    %434 = vector.broadcast %433 : vector<1x128xf32> to vector<8x128xf32>
    %435 = arith.mulf %432, %434 : vector<8x128xf32>
    %c120_i32_241 = arith.constant 120 : i32
    %436 = tpu.dynamic_rotate %411 by %c120_i32_241 dim 1 : vector<8x128xf32>, i32 -> vector<8x128xf32>
    %c7_242 = arith.constant 7 : index
    %c0_243 = arith.constant 0 : index
    %437 = vector.load %arg5[%c7_242, %c0_243] : memref<18x128xf32, #tpu.memory_space<vmem>>, vector<1x128xf32>
    %438 = vector.broadcast %437 : vector<1x128xf32> to vector<8x128xf32>
    %439 = arith.mulf %436, %438 : vector<8x128xf32>
    %c119_i32_244 = arith.constant 119 : i32
    %440 = tpu.dynamic_rotate %411 by %c119_i32_244 dim 1 : vector<8x128xf32>, i32 -> vector<8x128xf32>
    %c8_245 = arith.constant 8 : index
    %c0_246 = arith.constant 0 : index
    %441 = vector.load %arg5[%c8_245, %c0_246] : memref<18x128xf32, #tpu.memory_space<vmem>>, vector<1x128xf32>
    %442 = vector.broadcast %441 : vector<1x128xf32> to vector<8x128xf32>
    %443 = arith.mulf %440, %442 : vector<8x128xf32>
    %c16_247 = arith.constant 16 : index
    %c0_248 = arith.constant 0 : index
    %444 = vector.load %arg7[%c16_247, %c0_248] : memref<40x10xf32, #tpu.memory_space<vmem>>, vector<8x1xf32>
    %445 = vector.broadcast %444 : vector<8x1xf32> to vector<8x128xf32>
    %446 = arith.mulf %445, %415 : vector<8x128xf32>
    %c16_249 = arith.constant 16 : index
    %c1_250 = arith.constant 1 : index
    %447 = vector.load %arg7[%c16_249, %c1_250] : memref<40x10xf32, #tpu.memory_space<vmem>>, vector<8x1xf32>
    %448 = vector.broadcast %447 : vector<8x1xf32> to vector<8x128xf32>
    %449 = arith.mulf %448, %419 : vector<8x128xf32>
    %450 = arith.addf %446, %449 : vector<8x128xf32>
    %c16_251 = arith.constant 16 : index
    %c2_252 = arith.constant 2 : index
    %451 = vector.load %arg7[%c16_251, %c2_252] : memref<40x10xf32, #tpu.memory_space<vmem>>, vector<8x1xf32>
    %452 = vector.broadcast %451 : vector<8x1xf32> to vector<8x128xf32>
    %453 = arith.mulf %452, %423 : vector<8x128xf32>
    %454 = arith.addf %450, %453 : vector<8x128xf32>
    %c16_253 = arith.constant 16 : index
    %c3_254 = arith.constant 3 : index
    %455 = vector.load %arg7[%c16_253, %c3_254] : memref<40x10xf32, #tpu.memory_space<vmem>>, vector<8x1xf32>
    %456 = vector.broadcast %455 : vector<8x1xf32> to vector<8x128xf32>
    %457 = arith.mulf %456, %427 : vector<8x128xf32>
    %458 = arith.addf %454, %457 : vector<8x128xf32>
    %c16_255 = arith.constant 16 : index
    %c4_256 = arith.constant 4 : index
    %459 = vector.load %arg7[%c16_255, %c4_256] : memref<40x10xf32, #tpu.memory_space<vmem>>, vector<8x1xf32>
    %460 = vector.broadcast %459 : vector<8x1xf32> to vector<8x128xf32>
    %461 = arith.mulf %460, %411 : vector<8x128xf32>
    %462 = arith.addf %458, %461 : vector<8x128xf32>
    %c16_257 = arith.constant 16 : index
    %c5_258 = arith.constant 5 : index
    %463 = vector.load %arg7[%c16_257, %c5_258] : memref<40x10xf32, #tpu.memory_space<vmem>>, vector<8x1xf32>
    %464 = vector.broadcast %463 : vector<8x1xf32> to vector<8x128xf32>
    %465 = arith.mulf %464, %431 : vector<8x128xf32>
    %466 = arith.addf %462, %465 : vector<8x128xf32>
    %c16_259 = arith.constant 16 : index
    %c6_260 = arith.constant 6 : index
    %467 = vector.load %arg7[%c16_259, %c6_260] : memref<40x10xf32, #tpu.memory_space<vmem>>, vector<8x1xf32>
    %468 = vector.broadcast %467 : vector<8x1xf32> to vector<8x128xf32>
    %469 = arith.mulf %468, %435 : vector<8x128xf32>
    %470 = arith.addf %466, %469 : vector<8x128xf32>
    %c16_261 = arith.constant 16 : index
    %c7_262 = arith.constant 7 : index
    %471 = vector.load %arg7[%c16_261, %c7_262] : memref<40x10xf32, #tpu.memory_space<vmem>>, vector<8x1xf32>
    %472 = vector.broadcast %471 : vector<8x1xf32> to vector<8x128xf32>
    %473 = arith.mulf %472, %439 : vector<8x128xf32>
    %474 = arith.addf %470, %473 : vector<8x128xf32>
    %c16_263 = arith.constant 16 : index
    %c8_264 = arith.constant 8 : index
    %475 = vector.load %arg7[%c16_263, %c8_264] : memref<40x10xf32, #tpu.memory_space<vmem>>, vector<8x1xf32>
    %476 = vector.broadcast %475 : vector<8x1xf32> to vector<8x128xf32>
    %477 = arith.mulf %476, %443 : vector<8x128xf32>
    %478 = arith.addf %474, %477 : vector<8x128xf32>
    %cst_265 = arith.constant 0.000000e+00 : f32
    %479 = vector.broadcast %cst_265 : f32 to vector<8x128xf32>
    %480 = arith.maximumf %270, %479 : vector<8x128xf32>
    %c9_i32_266 = arith.constant 9 : i32
    %481 = tpu.dynamic_rotate %480 by %c9_i32_266 dim 1 : vector<8x128xf32>, i32 -> vector<8x128xf32>
    %c0_267 = arith.constant 0 : index
    %c0_268 = arith.constant 0 : index
    %482 = vector.load %arg5[%c0_267, %c0_268] : memref<18x128xf32, #tpu.memory_space<vmem>>, vector<1x128xf32>
    %483 = vector.broadcast %482 : vector<1x128xf32> to vector<8x128xf32>
    %484 = arith.mulf %481, %483 : vector<8x128xf32>
    %c8_i32_269 = arith.constant 8 : i32
    %485 = tpu.dynamic_rotate %480 by %c8_i32_269 dim 1 : vector<8x128xf32>, i32 -> vector<8x128xf32>
    %c1_270 = arith.constant 1 : index
    %c0_271 = arith.constant 0 : index
    %486 = vector.load %arg5[%c1_270, %c0_271] : memref<18x128xf32, #tpu.memory_space<vmem>>, vector<1x128xf32>
    %487 = vector.broadcast %486 : vector<1x128xf32> to vector<8x128xf32>
    %488 = arith.mulf %485, %487 : vector<8x128xf32>
    %c7_i32_272 = arith.constant 7 : i32
    %489 = tpu.dynamic_rotate %480 by %c7_i32_272 dim 1 : vector<8x128xf32>, i32 -> vector<8x128xf32>
    %c2_273 = arith.constant 2 : index
    %c0_274 = arith.constant 0 : index
    %490 = vector.load %arg5[%c2_273, %c0_274] : memref<18x128xf32, #tpu.memory_space<vmem>>, vector<1x128xf32>
    %491 = vector.broadcast %490 : vector<1x128xf32> to vector<8x128xf32>
    %492 = arith.mulf %489, %491 : vector<8x128xf32>
    %c1_i32_275 = arith.constant 1 : i32
    %493 = tpu.dynamic_rotate %480 by %c1_i32_275 dim 1 : vector<8x128xf32>, i32 -> vector<8x128xf32>
    %c3_276 = arith.constant 3 : index
    %c0_277 = arith.constant 0 : index
    %494 = vector.load %arg5[%c3_276, %c0_277] : memref<18x128xf32, #tpu.memory_space<vmem>>, vector<1x128xf32>
    %495 = vector.broadcast %494 : vector<1x128xf32> to vector<8x128xf32>
    %496 = arith.mulf %493, %495 : vector<8x128xf32>
    %c127_i32_278 = arith.constant 127 : i32
    %497 = tpu.dynamic_rotate %480 by %c127_i32_278 dim 1 : vector<8x128xf32>, i32 -> vector<8x128xf32>
    %c5_279 = arith.constant 5 : index
    %c0_280 = arith.constant 0 : index
    %498 = vector.load %arg5[%c5_279, %c0_280] : memref<18x128xf32, #tpu.memory_space<vmem>>, vector<1x128xf32>
    %499 = vector.broadcast %498 : vector<1x128xf32> to vector<8x128xf32>
    %500 = arith.mulf %497, %499 : vector<8x128xf32>
    %c121_i32_281 = arith.constant 121 : i32
    %501 = tpu.dynamic_rotate %480 by %c121_i32_281 dim 1 : vector<8x128xf32>, i32 -> vector<8x128xf32>
    %c6_282 = arith.constant 6 : index
    %c0_283 = arith.constant 0 : index
    %502 = vector.load %arg5[%c6_282, %c0_283] : memref<18x128xf32, #tpu.memory_space<vmem>>, vector<1x128xf32>
    %503 = vector.broadcast %502 : vector<1x128xf32> to vector<8x128xf32>
    %504 = arith.mulf %501, %503 : vector<8x128xf32>
    %c120_i32_284 = arith.constant 120 : i32
    %505 = tpu.dynamic_rotate %480 by %c120_i32_284 dim 1 : vector<8x128xf32>, i32 -> vector<8x128xf32>
    %c7_285 = arith.constant 7 : index
    %c0_286 = arith.constant 0 : index
    %506 = vector.load %arg5[%c7_285, %c0_286] : memref<18x128xf32, #tpu.memory_space<vmem>>, vector<1x128xf32>
    %507 = vector.broadcast %506 : vector<1x128xf32> to vector<8x128xf32>
    %508 = arith.mulf %505, %507 : vector<8x128xf32>
    %c119_i32_287 = arith.constant 119 : i32
    %509 = tpu.dynamic_rotate %480 by %c119_i32_287 dim 1 : vector<8x128xf32>, i32 -> vector<8x128xf32>
    %c8_288 = arith.constant 8 : index
    %c0_289 = arith.constant 0 : index
    %510 = vector.load %arg5[%c8_288, %c0_289] : memref<18x128xf32, #tpu.memory_space<vmem>>, vector<1x128xf32>
    %511 = vector.broadcast %510 : vector<1x128xf32> to vector<8x128xf32>
    %512 = arith.mulf %509, %511 : vector<8x128xf32>
    %c24_290 = arith.constant 24 : index
    %c0_291 = arith.constant 0 : index
    %513 = vector.load %arg7[%c24_290, %c0_291] : memref<40x10xf32, #tpu.memory_space<vmem>>, vector<8x1xf32>
    %514 = vector.broadcast %513 : vector<8x1xf32> to vector<8x128xf32>
    %515 = arith.mulf %514, %484 : vector<8x128xf32>
    %c24_292 = arith.constant 24 : index
    %c1_293 = arith.constant 1 : index
    %516 = vector.load %arg7[%c24_292, %c1_293] : memref<40x10xf32, #tpu.memory_space<vmem>>, vector<8x1xf32>
    %517 = vector.broadcast %516 : vector<8x1xf32> to vector<8x128xf32>
    %518 = arith.mulf %517, %488 : vector<8x128xf32>
    %519 = arith.addf %515, %518 : vector<8x128xf32>
    %c24_294 = arith.constant 24 : index
    %c2_295 = arith.constant 2 : index
    %520 = vector.load %arg7[%c24_294, %c2_295] : memref<40x10xf32, #tpu.memory_space<vmem>>, vector<8x1xf32>
    %521 = vector.broadcast %520 : vector<8x1xf32> to vector<8x128xf32>
    %522 = arith.mulf %521, %492 : vector<8x128xf32>
    %523 = arith.addf %519, %522 : vector<8x128xf32>
    %c24_296 = arith.constant 24 : index
    %c3_297 = arith.constant 3 : index
    %524 = vector.load %arg7[%c24_296, %c3_297] : memref<40x10xf32, #tpu.memory_space<vmem>>, vector<8x1xf32>
    %525 = vector.broadcast %524 : vector<8x1xf32> to vector<8x128xf32>
    %526 = arith.mulf %525, %496 : vector<8x128xf32>
    %527 = arith.addf %523, %526 : vector<8x128xf32>
    %c24_298 = arith.constant 24 : index
    %c4_299 = arith.constant 4 : index
    %528 = vector.load %arg7[%c24_298, %c4_299] : memref<40x10xf32, #tpu.memory_space<vmem>>, vector<8x1xf32>
    %529 = vector.broadcast %528 : vector<8x1xf32> to vector<8x128xf32>
    %530 = arith.mulf %529, %480 : vector<8x128xf32>
    %531 = arith.addf %527, %530 : vector<8x128xf32>
    %c24_300 = arith.constant 24 : index
    %c5_301 = arith.constant 5 : index
    %532 = vector.load %arg7[%c24_300, %c5_301] : memref<40x10xf32, #tpu.memory_space<vmem>>, vector<8x1xf32>
    %533 = vector.broadcast %532 : vector<8x1xf32> to vector<8x128xf32>
    %534 = arith.mulf %533, %500 : vector<8x128xf32>
    %535 = arith.addf %531, %534 : vector<8x128xf32>
    %c24_302 = arith.constant 24 : index
    %c6_303 = arith.constant 6 : index
    %536 = vector.load %arg7[%c24_302, %c6_303] : memref<40x10xf32, #tpu.memory_space<vmem>>, vector<8x1xf32>
    %537 = vector.broadcast %536 : vector<8x1xf32> to vector<8x128xf32>
    %538 = arith.mulf %537, %504 : vector<8x128xf32>
    %539 = arith.addf %535, %538 : vector<8x128xf32>
    %c24_304 = arith.constant 24 : index
    %c7_305 = arith.constant 7 : index
    %540 = vector.load %arg7[%c24_304, %c7_305] : memref<40x10xf32, #tpu.memory_space<vmem>>, vector<8x1xf32>
    %541 = vector.broadcast %540 : vector<8x1xf32> to vector<8x128xf32>
    %542 = arith.mulf %541, %508 : vector<8x128xf32>
    %543 = arith.addf %539, %542 : vector<8x128xf32>
    %c24_306 = arith.constant 24 : index
    %c8_307 = arith.constant 8 : index
    %544 = vector.load %arg7[%c24_306, %c8_307] : memref<40x10xf32, #tpu.memory_space<vmem>>, vector<8x1xf32>
    %545 = vector.broadcast %544 : vector<8x1xf32> to vector<8x128xf32>
    %546 = arith.mulf %545, %512 : vector<8x128xf32>
    %547 = arith.addf %543, %546 : vector<8x128xf32>
    %cst_308 = arith.constant 0.000000e+00 : f32
    %548 = vector.broadcast %cst_308 : f32 to vector<8x128xf32>
    %549 = arith.maximumf %271, %548 : vector<8x128xf32>
    %c9_i32_309 = arith.constant 9 : i32
    %550 = tpu.dynamic_rotate %549 by %c9_i32_309 dim 1 : vector<8x128xf32>, i32 -> vector<8x128xf32>
    %c0_310 = arith.constant 0 : index
    %c0_311 = arith.constant 0 : index
    %551 = vector.load %arg5[%c0_310, %c0_311] : memref<18x128xf32, #tpu.memory_space<vmem>>, vector<1x128xf32>
    %552 = vector.broadcast %551 : vector<1x128xf32> to vector<8x128xf32>
    %553 = arith.mulf %550, %552 : vector<8x128xf32>
    %c8_i32_312 = arith.constant 8 : i32
    %554 = tpu.dynamic_rotate %549 by %c8_i32_312 dim 1 : vector<8x128xf32>, i32 -> vector<8x128xf32>
    %c1_313 = arith.constant 1 : index
    %c0_314 = arith.constant 0 : index
    %555 = vector.load %arg5[%c1_313, %c0_314] : memref<18x128xf32, #tpu.memory_space<vmem>>, vector<1x128xf32>
    %556 = vector.broadcast %555 : vector<1x128xf32> to vector<8x128xf32>
    %557 = arith.mulf %554, %556 : vector<8x128xf32>
    %c7_i32_315 = arith.constant 7 : i32
    %558 = tpu.dynamic_rotate %549 by %c7_i32_315 dim 1 : vector<8x128xf32>, i32 -> vector<8x128xf32>
    %c2_316 = arith.constant 2 : index
    %c0_317 = arith.constant 0 : index
    %559 = vector.load %arg5[%c2_316, %c0_317] : memref<18x128xf32, #tpu.memory_space<vmem>>, vector<1x128xf32>
    %560 = vector.broadcast %559 : vector<1x128xf32> to vector<8x128xf32>
    %561 = arith.mulf %558, %560 : vector<8x128xf32>
    %c1_i32_318 = arith.constant 1 : i32
    %562 = tpu.dynamic_rotate %549 by %c1_i32_318 dim 1 : vector<8x128xf32>, i32 -> vector<8x128xf32>
    %c3_319 = arith.constant 3 : index
    %c0_320 = arith.constant 0 : index
    %563 = vector.load %arg5[%c3_319, %c0_320] : memref<18x128xf32, #tpu.memory_space<vmem>>, vector<1x128xf32>
    %564 = vector.broadcast %563 : vector<1x128xf32> to vector<8x128xf32>
    %565 = arith.mulf %562, %564 : vector<8x128xf32>
    %c127_i32_321 = arith.constant 127 : i32
    %566 = tpu.dynamic_rotate %549 by %c127_i32_321 dim 1 : vector<8x128xf32>, i32 -> vector<8x128xf32>
    %c5_322 = arith.constant 5 : index
    %c0_323 = arith.constant 0 : index
    %567 = vector.load %arg5[%c5_322, %c0_323] : memref<18x128xf32, #tpu.memory_space<vmem>>, vector<1x128xf32>
    %568 = vector.broadcast %567 : vector<1x128xf32> to vector<8x128xf32>
    %569 = arith.mulf %566, %568 : vector<8x128xf32>
    %c121_i32_324 = arith.constant 121 : i32
    %570 = tpu.dynamic_rotate %549 by %c121_i32_324 dim 1 : vector<8x128xf32>, i32 -> vector<8x128xf32>
    %c6_325 = arith.constant 6 : index
    %c0_326 = arith.constant 0 : index
    %571 = vector.load %arg5[%c6_325, %c0_326] : memref<18x128xf32, #tpu.memory_space<vmem>>, vector<1x128xf32>
    %572 = vector.broadcast %571 : vector<1x128xf32> to vector<8x128xf32>
    %573 = arith.mulf %570, %572 : vector<8x128xf32>
    %c120_i32_327 = arith.constant 120 : i32
    %574 = tpu.dynamic_rotate %549 by %c120_i32_327 dim 1 : vector<8x128xf32>, i32 -> vector<8x128xf32>
    %c7_328 = arith.constant 7 : index
    %c0_329 = arith.constant 0 : index
    %575 = vector.load %arg5[%c7_328, %c0_329] : memref<18x128xf32, #tpu.memory_space<vmem>>, vector<1x128xf32>
    %576 = vector.broadcast %575 : vector<1x128xf32> to vector<8x128xf32>
    %577 = arith.mulf %574, %576 : vector<8x128xf32>
    %c119_i32_330 = arith.constant 119 : i32
    %578 = tpu.dynamic_rotate %549 by %c119_i32_330 dim 1 : vector<8x128xf32>, i32 -> vector<8x128xf32>
    %c8_331 = arith.constant 8 : index
    %c0_332 = arith.constant 0 : index
    %579 = vector.load %arg5[%c8_331, %c0_332] : memref<18x128xf32, #tpu.memory_space<vmem>>, vector<1x128xf32>
    %580 = vector.broadcast %579 : vector<1x128xf32> to vector<8x128xf32>
    %581 = arith.mulf %578, %580 : vector<8x128xf32>
    %c32_333 = arith.constant 32 : index
    %c0_334 = arith.constant 0 : index
    %582 = vector.load %arg7[%c32_333, %c0_334] : memref<40x10xf32, #tpu.memory_space<vmem>>, vector<8x1xf32>
    %583 = vector.broadcast %582 : vector<8x1xf32> to vector<8x128xf32>
    %584 = arith.mulf %583, %553 : vector<8x128xf32>
    %c32_335 = arith.constant 32 : index
    %c1_336 = arith.constant 1 : index
    %585 = vector.load %arg7[%c32_335, %c1_336] : memref<40x10xf32, #tpu.memory_space<vmem>>, vector<8x1xf32>
    %586 = vector.broadcast %585 : vector<8x1xf32> to vector<8x128xf32>
    %587 = arith.mulf %586, %557 : vector<8x128xf32>
    %588 = arith.addf %584, %587 : vector<8x128xf32>
    %c32_337 = arith.constant 32 : index
    %c2_338 = arith.constant 2 : index
    %589 = vector.load %arg7[%c32_337, %c2_338] : memref<40x10xf32, #tpu.memory_space<vmem>>, vector<8x1xf32>
    %590 = vector.broadcast %589 : vector<8x1xf32> to vector<8x128xf32>
    %591 = arith.mulf %590, %561 : vector<8x128xf32>
    %592 = arith.addf %588, %591 : vector<8x128xf32>
    %c32_339 = arith.constant 32 : index
    %c3_340 = arith.constant 3 : index
    %593 = vector.load %arg7[%c32_339, %c3_340] : memref<40x10xf32, #tpu.memory_space<vmem>>, vector<8x1xf32>
    %594 = vector.broadcast %593 : vector<8x1xf32> to vector<8x128xf32>
    %595 = arith.mulf %594, %565 : vector<8x128xf32>
    %596 = arith.addf %592, %595 : vector<8x128xf32>
    %c32_341 = arith.constant 32 : index
    %c4_342 = arith.constant 4 : index
    %597 = vector.load %arg7[%c32_341, %c4_342] : memref<40x10xf32, #tpu.memory_space<vmem>>, vector<8x1xf32>
    %598 = vector.broadcast %597 : vector<8x1xf32> to vector<8x128xf32>
    %599 = arith.mulf %598, %549 : vector<8x128xf32>
    %600 = arith.addf %596, %599 : vector<8x128xf32>
    %c32_343 = arith.constant 32 : index
    %c5_344 = arith.constant 5 : index
    %601 = vector.load %arg7[%c32_343, %c5_344] : memref<40x10xf32, #tpu.memory_space<vmem>>, vector<8x1xf32>
    %602 = vector.broadcast %601 : vector<8x1xf32> to vector<8x128xf32>
    %603 = arith.mulf %602, %569 : vector<8x128xf32>
    %604 = arith.addf %600, %603 : vector<8x128xf32>
    %c32_345 = arith.constant 32 : index
    %c6_346 = arith.constant 6 : index
    %605 = vector.load %arg7[%c32_345, %c6_346] : memref<40x10xf32, #tpu.memory_space<vmem>>, vector<8x1xf32>
    %606 = vector.broadcast %605 : vector<8x1xf32> to vector<8x128xf32>
    %607 = arith.mulf %606, %573 : vector<8x128xf32>
    %608 = arith.addf %604, %607 : vector<8x128xf32>
    %c32_347 = arith.constant 32 : index
    %c7_348 = arith.constant 7 : index
    %609 = vector.load %arg7[%c32_347, %c7_348] : memref<40x10xf32, #tpu.memory_space<vmem>>, vector<8x1xf32>
    %610 = vector.broadcast %609 : vector<8x1xf32> to vector<8x128xf32>
    %611 = arith.mulf %610, %577 : vector<8x128xf32>
    %612 = arith.addf %608, %611 : vector<8x128xf32>
    %c32_349 = arith.constant 32 : index
    %c8_350 = arith.constant 8 : index
    %613 = vector.load %arg7[%c32_349, %c8_350] : memref<40x10xf32, #tpu.memory_space<vmem>>, vector<8x1xf32>
    %614 = vector.broadcast %613 : vector<8x1xf32> to vector<8x128xf32>
    %615 = arith.mulf %614, %581 : vector<8x128xf32>
    %616 = arith.addf %612, %615 : vector<8x128xf32>
    %617 = tpu.concatenate %340, %409, %478, %547, %616 in 0 : vector<8x128xf32>, vector<8x128xf32>, vector<8x128xf32>, vector<8x128xf32>, vector<8x128xf32> -> vector<40x128xf32>
    %c0_351 = arith.constant 0 : index
    %c0_352 = arith.constant 0 : index
    %618 = vector.load %arg10[%c0_351, %c0_352] : memref<40x40xbf16, #tpu.memory_space<vmem>>, vector<40x40xbf16>
    %619 = arith.truncf %617 : vector<40x128xf32> to vector<40x128xbf16>
    %cst_353 = arith.constant dense<0.000000e+00> : vector<40x128xf32>
    %620 = tpu.matmul %618, %619, %cst_353 {dimension_numbers = #tpu.dot_dimension_numbers<[1], [0], [0], [1], [0, 0, 1, 1], [], []>} : vector<40x40xbf16>, vector<40x128xbf16>, vector<40x128xf32> -> vector<40x128xf32>
    %c0_354 = arith.constant 0 : index
    %c9_355 = arith.constant 9 : index
    %621 = vector.load %arg7[%c0_354, %c9_355] : memref<40x10xf32, #tpu.memory_space<vmem>>, vector<40x1xf32>
    %622 = vector.broadcast %621 : vector<40x1xf32> to vector<40x128xf32>
    %623 = arith.addf %620, %622 : vector<40x128xf32>
    %624 = vector.extract_strided_slice %623 {offsets = [0, 0], sizes = [8, 128], strides = [1, 1]} : vector<40x128xf32> to vector<8x128xf32>
    %625 = vector.extract_strided_slice %623 {offsets = [8, 0], sizes = [8, 128], strides = [1, 1]} : vector<40x128xf32> to vector<8x128xf32>
    %626 = vector.extract_strided_slice %623 {offsets = [16, 0], sizes = [8, 128], strides = [1, 1]} : vector<40x128xf32> to vector<8x128xf32>
    %627 = vector.extract_strided_slice %623 {offsets = [24, 0], sizes = [8, 128], strides = [1, 1]} : vector<40x128xf32> to vector<8x128xf32>
    %628 = vector.extract_strided_slice %623 {offsets = [32, 0], sizes = [8, 128], strides = [1, 1]} : vector<40x128xf32> to vector<8x128xf32>
    %629 = arith.addf %624, %625 : vector<8x128xf32>
    %630 = arith.addf %626, %627 : vector<8x128xf32>
    %631 = arith.addf %628, %15 : vector<8x128xf32>
    %cst_356 = arith.constant 0.000000e+00 : f32
    %632 = vector.broadcast %cst_356 : f32 to vector<8x128xf32>
    %633 = arith.maximumf %629, %632 : vector<8x128xf32>
    %c18_i32 = arith.constant 18 : i32
    %634 = tpu.dynamic_rotate %633 by %c18_i32 dim 1 : vector<8x128xf32>, i32 -> vector<8x128xf32>
    %c9_357 = arith.constant 9 : index
    %c0_358 = arith.constant 0 : index
    %635 = vector.load %arg5[%c9_357, %c0_358] : memref<18x128xf32, #tpu.memory_space<vmem>>, vector<1x128xf32>
    %636 = vector.broadcast %635 : vector<1x128xf32> to vector<8x128xf32>
    %637 = arith.mulf %634, %636 : vector<8x128xf32>
    %c16_i32 = arith.constant 16 : i32
    %638 = tpu.dynamic_rotate %633 by %c16_i32 dim 1 : vector<8x128xf32>, i32 -> vector<8x128xf32>
    %c10 = arith.constant 10 : index
    %c0_359 = arith.constant 0 : index
    %639 = vector.load %arg5[%c10, %c0_359] : memref<18x128xf32, #tpu.memory_space<vmem>>, vector<1x128xf32>
    %640 = vector.broadcast %639 : vector<1x128xf32> to vector<8x128xf32>
    %641 = arith.mulf %638, %640 : vector<8x128xf32>
    %c14_i32 = arith.constant 14 : i32
    %642 = tpu.dynamic_rotate %633 by %c14_i32 dim 1 : vector<8x128xf32>, i32 -> vector<8x128xf32>
    %c11 = arith.constant 11 : index
    %c0_360 = arith.constant 0 : index
    %643 = vector.load %arg5[%c11, %c0_360] : memref<18x128xf32, #tpu.memory_space<vmem>>, vector<1x128xf32>
    %644 = vector.broadcast %643 : vector<1x128xf32> to vector<8x128xf32>
    %645 = arith.mulf %642, %644 : vector<8x128xf32>
    %c2_i32 = arith.constant 2 : i32
    %646 = tpu.dynamic_rotate %633 by %c2_i32 dim 1 : vector<8x128xf32>, i32 -> vector<8x128xf32>
    %c12 = arith.constant 12 : index
    %c0_361 = arith.constant 0 : index
    %647 = vector.load %arg5[%c12, %c0_361] : memref<18x128xf32, #tpu.memory_space<vmem>>, vector<1x128xf32>
    %648 = vector.broadcast %647 : vector<1x128xf32> to vector<8x128xf32>
    %649 = arith.mulf %646, %648 : vector<8x128xf32>
    %c126_i32 = arith.constant 126 : i32
    %650 = tpu.dynamic_rotate %633 by %c126_i32 dim 1 : vector<8x128xf32>, i32 -> vector<8x128xf32>
    %c14 = arith.constant 14 : index
    %c0_362 = arith.constant 0 : index
    %651 = vector.load %arg5[%c14, %c0_362] : memref<18x128xf32, #tpu.memory_space<vmem>>, vector<1x128xf32>
    %652 = vector.broadcast %651 : vector<1x128xf32> to vector<8x128xf32>
    %653 = arith.mulf %650, %652 : vector<8x128xf32>
    %c114_i32 = arith.constant 114 : i32
    %654 = tpu.dynamic_rotate %633 by %c114_i32 dim 1 : vector<8x128xf32>, i32 -> vector<8x128xf32>
    %c15 = arith.constant 15 : index
    %c0_363 = arith.constant 0 : index
    %655 = vector.load %arg5[%c15, %c0_363] : memref<18x128xf32, #tpu.memory_space<vmem>>, vector<1x128xf32>
    %656 = vector.broadcast %655 : vector<1x128xf32> to vector<8x128xf32>
    %657 = arith.mulf %654, %656 : vector<8x128xf32>
    %c112_i32 = arith.constant 112 : i32
    %658 = tpu.dynamic_rotate %633 by %c112_i32 dim 1 : vector<8x128xf32>, i32 -> vector<8x128xf32>
    %c16_364 = arith.constant 16 : index
    %c0_365 = arith.constant 0 : index
    %659 = vector.load %arg5[%c16_364, %c0_365] : memref<18x128xf32, #tpu.memory_space<vmem>>, vector<1x128xf32>
    %660 = vector.broadcast %659 : vector<1x128xf32> to vector<8x128xf32>
    %661 = arith.mulf %658, %660 : vector<8x128xf32>
    %c110_i32 = arith.constant 110 : i32
    %662 = tpu.dynamic_rotate %633 by %c110_i32 dim 1 : vector<8x128xf32>, i32 -> vector<8x128xf32>
    %c17 = arith.constant 17 : index
    %c0_366 = arith.constant 0 : index
    %663 = vector.load %arg5[%c17, %c0_366] : memref<18x128xf32, #tpu.memory_space<vmem>>, vector<1x128xf32>
    %664 = vector.broadcast %663 : vector<1x128xf32> to vector<8x128xf32>
    %665 = arith.mulf %662, %664 : vector<8x128xf32>
    %c0_367 = arith.constant 0 : index
    %c0_368 = arith.constant 0 : index
    %666 = vector.load %arg8[%c0_367, %c0_368] : memref<8x10xf32, #tpu.memory_space<vmem>>, vector<8x1xf32>
    %667 = vector.broadcast %666 : vector<8x1xf32> to vector<8x128xf32>
    %668 = arith.mulf %667, %637 : vector<8x128xf32>
    %c0_369 = arith.constant 0 : index
    %c1_370 = arith.constant 1 : index
    %669 = vector.load %arg8[%c0_369, %c1_370] : memref<8x10xf32, #tpu.memory_space<vmem>>, vector<8x1xf32>
    %670 = vector.broadcast %669 : vector<8x1xf32> to vector<8x128xf32>
    %671 = arith.mulf %670, %641 : vector<8x128xf32>
    %672 = arith.addf %668, %671 : vector<8x128xf32>
    %c0_371 = arith.constant 0 : index
    %c2_372 = arith.constant 2 : index
    %673 = vector.load %arg8[%c0_371, %c2_372] : memref<8x10xf32, #tpu.memory_space<vmem>>, vector<8x1xf32>
    %674 = vector.broadcast %673 : vector<8x1xf32> to vector<8x128xf32>
    %675 = arith.mulf %674, %645 : vector<8x128xf32>
    %676 = arith.addf %672, %675 : vector<8x128xf32>
    %c0_373 = arith.constant 0 : index
    %c3_374 = arith.constant 3 : index
    %677 = vector.load %arg8[%c0_373, %c3_374] : memref<8x10xf32, #tpu.memory_space<vmem>>, vector<8x1xf32>
    %678 = vector.broadcast %677 : vector<8x1xf32> to vector<8x128xf32>
    %679 = arith.mulf %678, %649 : vector<8x128xf32>
    %680 = arith.addf %676, %679 : vector<8x128xf32>
    %c0_375 = arith.constant 0 : index
    %c4_376 = arith.constant 4 : index
    %681 = vector.load %arg8[%c0_375, %c4_376] : memref<8x10xf32, #tpu.memory_space<vmem>>, vector<8x1xf32>
    %682 = vector.broadcast %681 : vector<8x1xf32> to vector<8x128xf32>
    %683 = arith.mulf %682, %633 : vector<8x128xf32>
    %684 = arith.addf %680, %683 : vector<8x128xf32>
    %c0_377 = arith.constant 0 : index
    %c5_378 = arith.constant 5 : index
    %685 = vector.load %arg8[%c0_377, %c5_378] : memref<8x10xf32, #tpu.memory_space<vmem>>, vector<8x1xf32>
    %686 = vector.broadcast %685 : vector<8x1xf32> to vector<8x128xf32>
    %687 = arith.mulf %686, %653 : vector<8x128xf32>
    %688 = arith.addf %684, %687 : vector<8x128xf32>
    %c0_379 = arith.constant 0 : index
    %c6_380 = arith.constant 6 : index
    %689 = vector.load %arg8[%c0_379, %c6_380] : memref<8x10xf32, #tpu.memory_space<vmem>>, vector<8x1xf32>
    %690 = vector.broadcast %689 : vector<8x1xf32> to vector<8x128xf32>
    %691 = arith.mulf %690, %657 : vector<8x128xf32>
    %692 = arith.addf %688, %691 : vector<8x128xf32>
    %c0_381 = arith.constant 0 : index
    %c7_382 = arith.constant 7 : index
    %693 = vector.load %arg8[%c0_381, %c7_382] : memref<8x10xf32, #tpu.memory_space<vmem>>, vector<8x1xf32>
    %694 = vector.broadcast %693 : vector<8x1xf32> to vector<8x128xf32>
    %695 = arith.mulf %694, %661 : vector<8x128xf32>
    %696 = arith.addf %692, %695 : vector<8x128xf32>
    %c0_383 = arith.constant 0 : index
    %c8_384 = arith.constant 8 : index
    %697 = vector.load %arg8[%c0_383, %c8_384] : memref<8x10xf32, #tpu.memory_space<vmem>>, vector<8x1xf32>
    %698 = vector.broadcast %697 : vector<8x1xf32> to vector<8x128xf32>
    %699 = arith.mulf %698, %665 : vector<8x128xf32>
    %700 = arith.addf %696, %699 : vector<8x128xf32>
    %c0_385 = arith.constant 0 : index
    %c0_386 = arith.constant 0 : index
    %701 = vector.load %arg11[%c0_385, %c0_386] : memref<8x8xbf16, #tpu.memory_space<vmem>>, vector<8x8xbf16>
    %702 = arith.truncf %700 : vector<8x128xf32> to vector<8x128xbf16>
    %cst_387 = arith.constant dense<0.000000e+00> : vector<8x128xf32>
    %703 = tpu.matmul %701, %702, %cst_387 {dimension_numbers = #tpu.dot_dimension_numbers<[1], [0], [0], [1], [0, 0, 1, 1], [], []>} : vector<8x8xbf16>, vector<8x128xbf16>, vector<8x128xf32> -> vector<8x128xf32>
    %c0_388 = arith.constant 0 : index
    %c9_389 = arith.constant 9 : index
    %704 = vector.load %arg8[%c0_388, %c9_389] : memref<8x10xf32, #tpu.memory_space<vmem>>, vector<8x1xf32>
    %705 = vector.broadcast %704 : vector<8x1xf32> to vector<8x128xf32>
    %706 = arith.addf %703, %705 : vector<8x128xf32>
    %707 = arith.addf %15, %706 : vector<8x128xf32>
    %708 = tpu.concatenate %629, %630, %631, %707 in 0 : vector<8x128xf32>, vector<8x128xf32>, vector<8x128xf32>, vector<8x128xf32> -> vector<32x128xf32>
    %c0_390 = arith.constant 0 : index
    %c0_391 = arith.constant 0 : index
    %c0_392 = arith.constant 0 : index
    %709 = vector.load %arg12[%c0_390, %c0_391, %c0_392] : memref<1x32x128xf32, #tpu.memory_space<vmem>>, vector<1x32x128xf32>
    %710 = vector.shape_cast %709 : vector<1x32x128xf32> to vector<32x128xf32>
    %711 = vector.shape_cast %708 : vector<32x128xf32> to vector<1x32x128xf32>
    tpu.vector_store %arg12[%c0_390, %c0_391, %c0_392], %711 {strides = array<i32>} : memref<1x32x128xf32, #tpu.memory_space<vmem>>, vector<1x32x128xf32>,
    return
  }
  func.func @transform_0(%arg0: i32) -> (i32, i32, i32) {
    %c0_i32 = arith.constant 0 : i32
    %c0_i32_0 = arith.constant 0 : i32
    %c0_i32_1 = arith.constant 0 : i32
    return %arg0, %c0_i32, %c0_i32_0 : i32, i32, i32
  }
  func.func @transform_1(%arg0: i32) -> (i32, i32, i32) {
    %c0_i32 = arith.constant 0 : i32
    %c0_i32_0 = arith.constant 0 : i32
    %c0_i32_1 = arith.constant 0 : i32
    return %arg0, %c0_i32, %c0_i32_0 : i32, i32, i32
  }
  func.func @transform_2(%arg0: i32) -> (i32, i32) {
    %c0_i32 = arith.constant 0 : i32
    %c0_i32_0 = arith.constant 0 : i32
    %c0_i32_1 = arith.constant 0 : i32
    return %c0_i32, %c0_i32_0 : i32, i32
  }
  func.func @transform_3(%arg0: i32) -> (i32, i32) {
    %c0_i32 = arith.constant 0 : i32
    %c0_i32_0 = arith.constant 0 : i32
    %c0_i32_1 = arith.constant 0 : i32
    return %c0_i32, %c0_i32_0 : i32, i32
  }
  func.func @transform_4(%arg0: i32) -> (i32, i32) {
    %c0_i32 = arith.constant 0 : i32
    %c0_i32_0 = arith.constant 0 : i32
    %c0_i32_1 = arith.constant 0 : i32
    return %c0_i32, %c0_i32_0 : i32, i32
  }
  func.func @transform_5(%arg0: i32) -> (i32, i32) {
    %c0_i32 = arith.constant 0 : i32
    %c0_i32_0 = arith.constant 0 : i32
    %c0_i32_1 = arith.constant 0 : i32
    return %c0_i32, %c0_i32_0 : i32, i32
  }
  func.func @transform_6(%arg0: i32) -> (i32, i32) {
    %c0_i32 = arith.constant 0 : i32
    %c0_i32_0 = arith.constant 0 : i32
    %c0_i32_1 = arith.constant 0 : i32
    return %c0_i32, %c0_i32_0 : i32, i32
  }
  func.func @transform_7(%arg0: i32) -> (i32, i32) {
    %c0_i32 = arith.constant 0 : i32
    %c0_i32_0 = arith.constant 0 : i32
    %c0_i32_1 = arith.constant 0 : i32
    return %c0_i32, %c0_i32_0 : i32, i32
  }
  func.func @transform_8(%arg0: i32) -> (i32, i32) {
    %c0_i32 = arith.constant 0 : i32
    %c0_i32_0 = arith.constant 0 : i32
    %c0_i32_1 = arith.constant 0 : i32
    return %c0_i32, %c0_i32_0 : i32, i32
  }
  func.func @transform_9(%arg0: i32) -> (i32, i32) {
    %c0_i32 = arith.constant 0 : i32
    %c0_i32_0 = arith.constant 0 : i32
    %c0_i32_1 = arith.constant 0 : i32
    return %c0_i32, %c0_i32_0 : i32, i32
  }
  func.func @transform_10(%arg0: i32) -> (i32, i32) {
    %c0_i32 = arith.constant 0 : i32
    %c0_i32_0 = arith.constant 0 : i32
    %c0_i32_1 = arith.constant 0 : i32
    return %c0_i32, %c0_i32_0 : i32, i32
  }
  func.func @transform_11(%arg0: i32) -> (i32, i32, i32) {
    %c0_i32 = arith.constant 0 : i32
    %c0_i32_0 = arith.constant 0 : i32
    %c0_i32_1 = arith.constant 0 : i32
    return %arg0, %c0_i32, %c0_i32_0 : i32, i32, i32
  }
}

</mosaic_0001>

<bundles_post_ra>
// kernel: new_cell_forward.1
= control target key start
LH: loop header
LB: loop body
LE: loop exit
PB: predicated region body
PF: predicated region fallthrough
CT: control target
= control target key end

     0   :  { %v2476_v0 = vmov 0   ;;  %v2485_v1 = vmov 0.0   ;;  %vm1502_vm0 = vmmov 0   ;;  %v2477_v8 = vmov 1   ;;  %s1512_s14 = smov 9   ;;  %s1513_s15 = smov 8   ;;  %s2464_s5 = inlined_call_operand.vmem [shape: f32[40,10], index: 5, kind: input, shape index: {}]   ;;  %s2465_s0 = inlined_call_operand.vmem [shape: f32[1,8,128], index: 0, kind: input, shape index: {}]   ;;  %s2466_s1 = inlined_call_operand.vmem [shape: f32[1,8,128], index: 1, kind: input, shape index: {}]   ;;  %s2467_s2 = inlined_call_operand.vmem [shape: bf16[16,16], index: 2, kind: input, shape index: {}]   ;;  %s2468_s3 = inlined_call_operand.vmem [shape: f32[16,1], index: 3, kind: input, shape index: {}]   ;;  %s2469_s6 = inlined_call_operand.vmem [shape: f32[40,10], index: 6, kind: input, shape index: {}]   ;;  %s2470_s8 = inlined_call_operand.vmem [shape: bf16[40,40], index: 8, kind: input, shape index: {}]   ;;  %s2471_s4 = inlined_call_operand.vmem [shape: f32[18,128], index: 4, kind: input, shape index: {}]   ;;  %s2472_s9 = inlined_call_operand.vmem [shape: bf16[40,40], index: 9, kind: input, shape index: {}]   ;;  %s2473_s7 = inlined_call_operand.vmem [shape: f32[8,10], index: 7, kind: input, shape index: {}]   ;;  %s2474_s11 = inlined_call_operand.vmem [shape: f32[1,32,128], index: 11, kind: output, shape index: {}]   ;;  %s2475_s10 = inlined_call_operand.vmem [shape: bf16[8,8], index: 10, kind: input, shape index: {}]  }
   0x1   :  { %1417 = vset.pattern.permute.xlu1 %v2476_v0  ;;  %1341 = vmatprep.subr.bf16.mxu0 %v2485_v1  ;;  %v1593_v2 = vld [vmem:[%s2464_s5 + $0x20] sm:$0xff]  ;;  %v1607_v7 = vld [vmem:[%s2464_s5 + $0x10] sm:$0xff]  ;;  %vm63_vm1 = vcmask 130048   ;;  %v2489_v11 = vmov 5   ;;  %v47_v12 = vld [vmem:[%s2468_s3 + $0x8] sm:$0xff]  ;;  %v2484_v16 = vmov 2  }
   0x2   :  { %v39_v3 = vld [vmem:[%s2465_s0] sm:$0xff]  ;;  %421 = vperm.xlu1 %1417, %v1593_v2   ;;  %1343 = vmatprep.mubr.msk.bf16.mxu0 %vm1502_vm0, %v2485_v1  ;;  %v1632_v13 = vld [vmem:[%s2464_s5 + $0x18] sm:$0xff]  ;;  %v1644_v15 = vld [vmem:[%s2464_s5 + $0x8] sm:$0xff]  ;;  %v2491_v18 = vmov 3   ;;  %v2487_v19 = vmov 6   ;;  %v2493_v20 = vmov 4  }
   0x3   :  { %v41_v4 = vld [vmem:[%s2466_s1] sm:$0xff]  ;;  %v40_v5 = vmax.f32 %v39_v3, 0.0  ;;  %1420 = vset.pattern.permute.xlu0 %v2477_v8  ;;  %1347 = vmatprep.subr.bf16.mxu1 %v2485_v1  ;;  %v2480_v21 = vmov 7   ;;  %v2482_v22 = vmov 8   ;;  %s1514_s16 = smov 119   ;;  %s1515_s17 = smov 7  }
   0x4   :  { %v42_v6 = vmax.f32 %v41_v4, 0.0  ;;  %316 = vperm.xlu0 %1420, %v1607_v7   ;;  %1353 = vmatprep.mubr.msk.bf16.mxu1 %vm1502_vm0, %v2485_v1  ;;  %v1491_v10 = vld [vmem:[%s2467_s2] sm:$0xff]   ;;  %s1516_s18 = smov 1   ;;  %s1517_s19 = smov 121   ;;  %v2478_v46 = vmov 9   ;;  %v1805_v54 = vld [vmem:[%s2469_s6 + $0x18] sm:$0xff] }
   0x5   :  { %v46_v14 = vld [vmem:[%s2468_s3] sm:$0xff]  ;;  %s1518_s20 = smov 120   ;;  %v1837_v63 = vld [vmem:[%s2469_s6 + $0x8] sm:$0xff]  ;;  %v1847_v3 = vld [vmem:[%s2469_s6 + $0x10] sm:$0xff]  ;;  %vm532_vm2 = vcmask 1043456   ;;  %vm522_vm3 = vcmask 326656  }
   0x6   :  { %v45_v9 = vpack.c.bf16 %v42_v6, %v40_v5  ;;  %1418 = vset.pattern.permute.xlu1 %v2477_v8  ;;  %v1654_v17 = vld [vmem:[%s2464_s5] sm:$0xff]  ;;  %s1511_s5 = smov 127   ;;  %2510 = vst [vmem:[#allocation4_spill] sm:$0xff] %v1847_v3  ;;  %s1520_s21 = smov 16   ;;  %vm1238_vm4 = vcmask 64512  }
   0x7   :  { %426 = vperm.xlu1 %1418, %v1593_v2   ;;  %v1784_v50 = vld [vmem:[%s2469_s6 + $0x20] sm:$0xff]  ;;  %s1522_s22 = smov 14   ;;  %s1523_s23 = smov 2  }
   0x8   :  { %1342 = vmatpush3.bf16.msra.mxu0 %v45_v9  ;;  %1423 = vset.pattern.permute.xlu0 %v2489_v11  ;;  %v1825_v60 = vld [vmem:[%s2469_s6] sm:$0xff]  ;;  %s1524_s24 = smov 126   ;;  %s1525_s0 = smov 114  }
   0x9   :  { %1365 = vmatprep.subr.bf16.mxu0 %v2485_v1  ;;  %450 = vperm.xlu0 %1423, %v1593_v2   ;;  %s1526_s1 = smov 112   ;;  %s1527_s2 = smov 110  }
   0xb   :  { %1344 = vmatmul.mubr.msk.bf16.vlgmr.msra.gmra.mxu0 %vm63_vm1, %v1491_v10  ;;  %1419 = vset.pattern.permute.xlu1 %v2476_v0 }
   0xc   :  { %1371 = vmatprep.mubr.msk.bf16.mxu0 %vm1502_vm0, %v2485_v1  ;;  %311 = vperm.xlu1 %1419, %v1607_v7   ;;  %v1936_v1 = vld [vmem:[%s2471_s4 + $0x3] ss:$0 sm:$0xff] }
   0xd   :  { %1424 = vset.pattern.permute.xlu0 %v2476_v0 }
   0xe   :  { %55 = vperm.xlu0 %1424, %v47_v12  }
  0x10   :  { %366 = vperm.xlu1 %1419, %v1632_v13  }
  0x12   :  { %50 = vperm.xlu0 %1424, %v46_v14  }
  0x14   :  { %1421 = vset.pattern.permute.xlu1 %v2477_v8 }
  0x15   :  { %371 = vperm.xlu1 %1421, %v1632_v13  }
  0x16   :  { %256 = vperm.xlu0 %1424, %v1644_v15  }
  0x19   :  { %1422 = vset.pattern.permute.xlu1 %v2484_v16 }
  0x1a   :  { %322 = vperm.xlu1 %1422, %v1607_v7   ;;  %1427 = vset.pattern.permute.xlu0 %v2484_v16 }
  0x1b   :  { %432 = vperm.xlu0 %1427, %v1593_v2  }
  0x1e   :  { %1425 = vset.pattern.permute.xlu1 %v2476_v0 }
  0x1f   :  { %176 = vperm.xlu1 %1425, %v1654_v17   ;;  %377 = vperm.xlu0 %1427, %v1632_v13  }
  0x23   :  { %1426 = vset.pattern.permute.xlu1 %v2477_v8  ;;  %187 = vperm.xlu0 %1427, %v1654_v17  }
  0x24   :  { %181 = vperm.xlu1 %1426, %v1654_v17  }
  0x27   :  { %1430 = vset.pattern.permute.xlu0 %v2491_v18 }
  0x28   :  { %261 = vperm.xlu1 %1426, %v1644_v15   ;;  %438 = vperm.xlu0 %1430, %v1593_v2  }
  0x2c   :  { %1428 = vset.pattern.permute.xlu1 %v2491_v18  ;;  %383 = vperm.xlu0 %1430, %v1632_v13  }
  0x2d   :  { %328 = vperm.xlu1 %1428, %v1607_v7  }
  0x30   :  { %273 = vperm.xlu0 %1430, %v1644_v15  }
  0x31   :  { %1429 = vset.pattern.permute.xlu1 %v2487_v19 }
  0x32   :  { %456 = vperm.xlu1 %1429, %v1593_v2  }
  0x34   :  { %1434 = vset.pattern.permute.xlu0 %v2493_v20 }
  0x35   :  { %444 = vperm.xlu0 %1434, %v1593_v2  }
  0x36   :  { %1431 = vset.pattern.permute.xlu1 %v2484_v16 }
  0x37   :  { %267 = vperm.xlu1 %1431, %v1644_v15  }
  0x39   :  { %334 = vperm.xlu0 %1434, %v1607_v7  }
  0x3b   :  { %1432 = vset.pattern.permute.xlu1 %v2493_v20 }
  0x3c   :  { %389 = vperm.xlu1 %1432, %v1632_v13  }
  0x3d   :  { %279 = vperm.xlu0 %1434, %v1644_v15  }
  0x40   :  { %1433 = vset.pattern.permute.xlu1 %v2491_v18 }
  0x41   :  { %193 = vperm.xlu1 %1433, %v1654_v17   ;;  %1440 = vset.pattern.permute.xlu0 %v2487_v19 }
  0x42   :  { %211 = vperm.xlu0 %1440, %v1654_v17  }
  0x45   :  { %1435 = vset.pattern.permute.xlu1 %v2489_v11 }
  0x46   :  { %340 = vperm.xlu1 %1435, %v1607_v7   ;;  %1441 = vset.pattern.permute.xlu0 %v2480_v21 }
  0x47   :  { %462 = vperm.xlu0 %1441, %v1593_v2  }
  0x4a   :  { %395 = vperm.xlu1 %1435, %v1632_v13  }
  0x4b   :  { %352 = vperm.xlu0 %1441, %v1607_v7  }
  0x4e   :  { %1436 = vset.pattern.permute.xlu1 %v2493_v20 }
  0x4f   :  { %199 = vperm.xlu1 %1436, %v1654_v17   ;;  %297 = vperm.xlu0 %1441, %v1644_v15  }
  0x53   :  { %1437 = vset.pattern.permute.xlu1 %v2487_v19  ;;  %1445 = vset.pattern.permute.xlu0 %v2482_v22 }
  0x54   :  { %346 = vperm.xlu1 %1437, %v1607_v7   ;;  %468 = vperm.xlu0 %1445, %v1593_v2  }
  0x58   :  { %401 = vperm.xlu1 %1437, %v1632_v13  }
  0x5c   :  { %1438 = vset.pattern.permute.xlu1 %v2489_v11 }
  0x5d   :  { %205 = vperm.xlu1 %1438, %v1654_v17  }
  0x61   :  { %285 = vperm.xlu1 %1438, %v1644_v15  }
  0x65   :  { %1439 = vset.pattern.permute.xlu1 %v2480_v21 }
  0x66   :  { %407 = vperm.xlu1 %1439, %v1632_v13  }
  0x6a   :  { %1442 = vset.pattern.permute.xlu1 %v2487_v19 }
  0x6b   :  { %291 = vperm.xlu1 %1442, %v1644_v15  }
  0x6f   :  { %1443 = vset.pattern.permute.xlu1 %v2482_v22 }
  0x70   :  { %358 = vperm.xlu1 %1443, %v1607_v7  }
  0x74   :  { %1444 = vset.pattern.permute.xlu1 %v2480_v21 }
  0x75   :  { %217 = vperm.xlu1 %1444, %v1654_v17  }
  0x79   :  { %1446 = vset.pattern.permute.xlu1 %v2482_v22 }
  0x7d   :  { %v1709_v23 = vpop.permute.xlu1 %421 }
  0x7f   :  { %v1713_v25 = vpop.permute.xlu0 %316 }
  0x82   :  { %v1711_v24 = vpop.permute.xlu1 %426 }
  0x84   :  { %v1717_v27 = vpop.permute.xlu0 %450 }
  0x87   :  { %v1715_v26 = vpop.permute.xlu1 %311 }
  0x89   :  { %v56_v29 = vpop.permute.xlu0 %55 }
  0x8b   :  { %v1719_v28 = vpop.permute.xlu1 %366 }
  0x8d   :  { %v51_v31 = vpop.permute.xlu0 %50 }
  0x90   :  { %v1721_v30 = vpop.permute.xlu1 %371 }
  0x91   :  { %v1799_v53 = vpop.permute.xlu0 %256 }
  0x95   :  { %v1725_v35 = vpop.permute.xlu1 %322 }
  0x96   :  { %v1811_v56 = vpop.permute.xlu0 %432 }
  0x9a   :  { %v1736_v41 = vpop.permute.xlu1 %176  ;;  %v1816_v58 = vpop.permute.xlu0 %377 }
  0x9e   :  { %v1829_v61 = vpop.permute.xlu0 %187 }
  0x9f   :  { %v1745_v42 = vpop.permute.xlu1 %181 }
  0xa3   :  { %v1750_v43 = vpop.permute.xlu1 %261 }
  0xa8   :  { %v1756_v44 = vpop.permute.xlu1 %328 }
  0xad   :  { %v1760_v45 = vpop.permute.xlu1 %456 }
  0xb2   :  { %v1768_v47 = vpop.permute.xlu1 %267 }
  0xb7   :  { %v1773_v48 = vpop.permute.xlu1 %389 }
  0xbc   :  { %v1779_v49 = vpop.permute.xlu1 %193 }
  0xc1   :  { %v1789_v51 = vpop.permute.xlu1 %340 }
  0xc5   :  { %v1796_v52 = vpop.permute.xlu1 %395 }
  0xca   :  { %v1808_v55 = vpop.permute.xlu1 %199 }
  0xcb   :  { %v101_v32 = vpop.f32.mrf.mxu0 }
  0xcc   :  { %v1723_v33 = vadd.f32 %v101_v32, %v51_v31 }
  0xcd   :  { %v1345_v34 = vpop.f32.mrf.mxu0 }
  0xce   :  { %2508 = vst [vmem:[#allocation2_spill] sm:$0xff] %v1723_v33  ;;  %v1728_v36 = vmax.f32 %v1723_v33, 0.0 }
  0xcf   :  { %v104_v37 = vpop.f32.mrf.mxu0  ;;  %v1813_v57 = vpop.permute.xlu1 %346 }
  0xd0   :  { %v105_v38 = vadd.f32 %v104_v37, %v56_v29  ;;  %141 = vrot.lane.b32.xlu0 %v1728_v36, %s1511_s5  ;;  %109 = vrot.lane.b32.xlu1 %v1728_v36, %s1512_s14 }
  0xd1   :  { %v1346_v39 = vpop.f32.mrf.mxu0 }
  0xd2   :  { %v1734_v40 = vmax.f32 %v105_v38, 0.0 }
  0xd3   :  { %v1819_v59 = vpop.permute.xlu1 %401 }
  0xd4   :  { %117 = vrot.lane.b32.xlu1 %v1728_v36, %s1513_s15  ;;  %250 = vrot.lane.b32.xlu0 %v1734_v40, %s1514_s16 }
  0xd8   :  { %125 = vrot.lane.b32.xlu1 %v1728_v36, %s1515_s17  ;;  %413 = vperm.xlu0 %1445, %v1632_v13   ;;  %v1831_v62 = vpop.permute.xlu1 %205 }
  0xd9   :  { %2509 = vst [vmem:[#allocation3_spill] sm:$0xff] %v1831_v62  ;;  %v2521_v62 = vmov 3  }
  0xdc   :  { %133 = vrot.lane.b32.xlu1 %v1728_v36, %s1516_s18  ;;  %303 = vperm.xlu0 %1445, %v1644_v15   ;;  %v1849_v4 = vpop.permute.xlu1 %285 }
  0xdd   :  { %2511 = vst [vmem:[#allocation5_spill] sm:$0xff] %v1849_v4 }
  0xe0   :  { %149 = vrot.lane.b32.xlu1 %v1728_v36, %s1517_s19  ;;  %1448 = vset.pattern.permute.xlu0 %v2478_v46 }
  0xe1   :  { %502 = vperm.xlu0 %1448, %v1632_v13   ;;  %v1855_v5 = vpop.permute.xlu1 %407 }
  0xe4   :  { %157 = vrot.lane.b32.xlu1 %v1728_v36, %s1518_s20 }
  0xe5   :  { %1451 = vset.pattern.permute.xlu0 %v2491_v18 }
  0xe6   :  { %957 = vperm.xlu0 %1451, %v1784_v50  }
  0xe8   :  { %229 = vrot.lane.b32.xlu1 %v1734_v40, %s1512_s14 }
  0xea   :  { %1452 = vset.pattern.permute.xlu0 %v2476_v0 }
  0xeb   :  { %940 = vperm.xlu0 %1452, %v1784_v50  }
  0xec   :  { %232 = vrot.lane.b32.xlu1 %v1734_v40, %s1513_s15 }
  0xef   :  { %860 = vperm.xlu0 %1452, %v1805_v54  }
  0xf0   :  { %235 = vrot.lane.b32.xlu1 %v1734_v40, %s1515_s17 }
  0xf3   :  { %620 = vperm.xlu0 %1452, %v1825_v60  }
  0xf4   :  { %238 = vrot.lane.b32.xlu1 %v1734_v40, %s1516_s18 }
  0xf7   :  { %1459 = vset.pattern.permute.xlu0 %v2477_v8 }
  0xf8   :  { %241 = vrot.lane.b32.xlu1 %v1734_v40, %s1511_s5  ;;  %705 = vperm.xlu0 %1459, %v1837_v63  }
  0xfc   :  { %244 = vrot.lane.b32.xlu1 %v1734_v40, %s1517_s19  ;;  %1460 = vset.pattern.permute.xlu0 %v2493_v20 }
  0xfd   :  { %963 = vperm.xlu0 %1460, %v1784_v50  }
 0x100   :  { %247 = vrot.lane.b32.xlu1 %v1734_v40, %s1518_s20 }
 0x101   :  { %803 = vperm.xlu0 %1460, %v1847_v3  }
 0x104   :  { %165 = vrot.lane.b32.xlu1 %v1728_v36, %s1514_s16 }
 0x105   :  { %1465 = vset.pattern.permute.xlu0 %v2489_v11 }
 0x106   :  { %809 = vperm.xlu0 %1465, %v1847_v3  }
 0x108   :  { %223 = vperm.xlu1 %1446, %v1654_v17  }
 0x10a   :  { %649 = vperm.xlu0 %1465, %v1825_v60  }
 0x10c   :  { %1447 = vset.pattern.permute.xlu1 %v2478_v46  ;;  %v1919_v46 = vld [vmem:[%s2471_s4 + $0x1] ss:$0 sm:$0xff] }
 0x10d   :  { %506 = vperm.xlu1 %1447, %v1593_v2   ;;  %v1842_v2 = vpop.permute.xlu0 %438  ;;  %2517 = vst [vmem:[#allocation11_spill] sm:$0xff] %v1919_v46 }
 0x10e   :  { %1469 = vset.pattern.permute.xlu0 %v2487_v19 }
 0x10f   :  { %975 = vperm.xlu0 %1469, %v1784_v50  }
 0x111   :  { %497 = vperm.xlu1 %1447, %v1607_v7   ;;  %v1857_v6 = vpop.permute.xlu0 %383  ;;  %v1862_v7 = vpop.permute.xlu1 %291 }
 0x112   :  { %2512 = vst [vmem:[#allocation6_spill] sm:$0xff] %v1862_v7 }
 0x113   :  { %815 = vperm.xlu0 %1469, %v1847_v3  }
 0x115   :  { %487 = vperm.xlu1 %1447, %v1654_v17   ;;  %v1865_v9 = vpop.permute.xlu0 %273  ;;  %v1871_v10 = vpop.permute.xlu1 %358 }
 0x116   :  { %2513 = vst [vmem:[#allocation7_spill] sm:$0xff] %v1871_v10 }
 0x117   :  { %735 = vperm.xlu0 %1469, %v1837_v63  }
 0x119   :  { %492 = vperm.xlu1 %1447, %v1644_v15   ;;  %v1874_v12 = vpop.permute.xlu0 %444  ;;  %v1879_v13 = vpop.permute.xlu1 %217 }
 0x11a   :  { %2514 = vst [vmem:[#allocation8_spill] sm:$0xff] %v1879_v13 }
 0x11b   :  { %1473 = vset.pattern.permute.xlu0 %v2480_v21 }
 0x11c   :  { %981 = vperm.xlu0 %1473, %v1784_v50  }
 0x11d   :  { %1449 = vset.pattern.permute.xlu1 %v2477_v8  ;;  %v1881_v14 = vpop.permute.xlu0 %334 }
 0x11e   :  { %945 = vperm.xlu1 %1449, %v1784_v50  }
 0x120   :  { %901 = vperm.xlu0 %1473, %v1805_v54  }
 0x121   :  { %v1887_v17 = vpop.permute.xlu0 %279 }
 0x122   :  { %1450 = vset.pattern.permute.xlu1 %v2484_v16 }
 0x123   :  { %951 = vperm.xlu1 %1450, %v1784_v50  }
 0x124   :  { %661 = vperm.xlu0 %1473, %v1825_v60  }
 0x125   :  { %v1892_v31 = vpop.permute.xlu0 %211 }
 0x126   :  { %2515 = vst [vmem:[#allocation9_spill] sm:$0xff] %v1892_v31 }
 0x127   :  { %1453 = vset.pattern.permute.xlu1 %v2476_v0 }
 0x128   :  { %780 = vperm.xlu1 %1453, %v1847_v3   ;;  %1475 = vset.pattern.permute.xlu0 %v2482_v22  ;;  %v1924_v22 = vld [vmem:[%s2471_s4] ss:$0 sm:$0xff] }
 0x129   :  { %v1898_v34 = vpop.permute.xlu0 %462  ;;  %987 = vperm.xlu0 %1475, %v1784_v50   ;;  %2518 = vst [vmem:[#allocation12_spill] sm:$0xff] %v1924_v22 }
 0x12c   :  { %1454 = vset.pattern.permute.xlu1 %v2477_v8 }
 0x12d   :  { %785 = vperm.xlu1 %1454, %v1847_v3   ;;  %v1906_v39 = vpop.permute.xlu0 %352 }
 0x131   :  { %865 = vperm.xlu1 %1454, %v1805_v54  }
 0x135   :  { %1455 = vset.pattern.permute.xlu1 %v2484_v16 }
 0x136   :  { %791 = vperm.xlu1 %1455, %v1847_v3  }
 0x13a   :  { %871 = vperm.xlu1 %1455, %v1805_v54  }
 0x13e   :  { %1456 = vset.pattern.permute.xlu1 %v2489_v11 }
 0x13f   :  { %969 = vperm.xlu1 %1456, %v1784_v50   ;;  %v1929_v50 = vld [vmem:[%s2471_s4 + $0x2] ss:$0 sm:$0xff] }
 0x140   :  { %2519 = vst [vmem:[#allocation13_spill] sm:$0xff] %v1929_v50 }
 0x142   :  { %v110_v15 = vpop.permute.xlu1 %109 }
 0x143   :  { %1457 = vset.pattern.permute.xlu1 %v2477_v8  ;;  %v1914_v8 = vpop.permute.xlu0 %297  ;;  %v116_v19 = vmul.f32 %v1924_v22, %v110_v15 }
 0x144   :  { %625 = vperm.xlu1 %1457, %v1825_v60   ;;  %2516 = vst [vmem:[#allocation10_spill] sm:$0xff] %v1914_v8 }
 0x145   :  { %v314_v31 = vmul.f32 %v1715_v26, %v116_v19 }
 0x146   :  { %v118_v29 = vpop.permute.xlu1 %117 }
 0x147   :  { %v1940_v20 = vpop.permute.xlu0 %468 }
 0x148   :  { %1458 = vset.pattern.permute.xlu1 %v2476_v0 }
 0x149   :  { %700 = vperm.xlu1 %1458, %v1837_v63  }
 0x14a   :  { %v126_v32 = vpop.permute.xlu1 %125 }
 0x14b   :  { %v132_v11 = vmul.f32 %v1929_v50, %v126_v32  ;;  %v142_v26 = vpop.permute.xlu0 %141 }
 0x14d   :  { %1461 = vset.pattern.permute.xlu1 %v2491_v18  ;;  %v325_v15 = vmul.f32 %v1725_v35, %v132_v11 }
 0x14e   :  { %v134_v37 = vpop.permute.xlu1 %133  ;;  %797 = vperm.xlu1 %1461, %v1847_v3   ;;  %v2520_v3 = vmov 4  }
 0x152   :  { %v1903_v38 = vpop.permute.xlu1 %149  ;;  %877 = vperm.xlu1 %1461, %v1805_v54  }
 0x156   :  { %v1910_v0 = vpop.permute.xlu1 %157  ;;  %1462 = vset.pattern.permute.xlu1 %v2484_v16  ;;  %v124_v16 = vmul.f32 %v1919_v46, %v118_v29  ;;  %v140_v29 = vmul.f32 %v1936_v1, %v134_v37 }
 0x157   :  { %631 = vperm.xlu1 %1462, %v1825_v60  }
 0x158   :  { %v319_v13 = vmul.f32 %v1713_v25, %v124_v16  ;;  %v331_v25 = vmul.f32 %v1756_v44, %v140_v29 }
 0x15a   :  { %v230_v21 = vpop.permute.xlu1 %229 }
 0x15b   :  { %711 = vperm.xlu1 %1462, %v1837_v63   ;;  %v231_v8 = vmul.f32 %v1924_v22, %v230_v21  ;;  %v1958_v21 = vld [vmem:[%s2471_s4 + $0x5] ss:$0 sm:$0xff] }
 0x15c   :  { %v1967_v22 = vmul.f32 %v1958_v21, %v142_v26 }
 0x15d   :  { %v369_v35 = vmul.f32 %v1719_v28, %v231_v8  ;;  %v424_v37 = vmul.f32 %v1709_v23, %v231_v8 }
 0x15e   :  { %v233_v18 = vpop.permute.xlu1 %232 }
 0x15f   :  { %v234_v33 = vmul.f32 %v1919_v46, %v233_v18  ;;  %1463 = vset.pattern.permute.xlu1 %v2520_v3  ;;  %v320_v46 = vadd.f32 %v319_v13, %v314_v31 }
 0x160   :  { %883 = vperm.xlu1 %1463, %v1805_v54  }
 0x161   :  { %v374_v7 = vmul.f32 %v1721_v30, %v234_v33  ;;  %v429_v4 = vmul.f32 %v1711_v24, %v234_v33  ;;  %v326_v13 = vadd.f32 %v325_v15, %v320_v46  ;;  %v337_v46 = vmul.f32 %v1881_v14, %v1728_v36  ;;  %v1979_v15 = vld [vmem:[%s2471_s4 + $0x6] ss:$0 sm:$0xff] }
 0x162   :  { %v236_v32 = vpop.permute.xlu1 %235  ;;  %v343_v14 = vmul.f32 %v1789_v51, %v1967_v22  ;;  %v264_v51 = vmul.f32 %v1750_v43, %v234_v33 }
 0x163   :  { %v237_v18 = vmul.f32 %v1929_v50, %v236_v32  ;;  %v375_v31 = vadd.f32 %v374_v7, %v369_v35  ;;  %v430_v32 = vadd.f32 %v429_v4, %v424_v37  ;;  %v332_v28 = vadd.f32 %v331_v25, %v326_v13 }
 0x164   :  { %1464 = vset.pattern.permute.xlu1 %v2521_v62  ;;  %v184_v62 = vmul.f32 %v1745_v42, %v124_v16  ;;  %v179_v7 = vmul.f32 %v1736_v41, %v116_v19  ;;  %v190_v19 = vmul.f32 %v1829_v61, %v132_v11  ;;  %v1992_v41 = vld [vmem:[%s2471_s4 + $0x7] ss:$0 sm:$0xff]  ;;  %v2522_v35 = vmov 5  }
 0x165   :  { %v380_v30 = vmul.f32 %v1816_v58, %v237_v18  ;;  %v435_v24 = vmul.f32 %v1811_v56, %v237_v18  ;;  %637 = vperm.xlu1 %1464, %v1825_v60   ;;  %v196_v37 = vmul.f32 %v1779_v49, %v140_v29  ;;  %v2012_v49 = vld [vmem:[%s2471_s4 + $0x8] ss:$0 sm:$0xff]  ;;  %v164_v43 = vmul.f32 %v1992_v41, %v1910_v0 }
 0x166   :  { %v239_v44 = vpop.permute.xlu1 %238  ;;  %v185_v26 = vadd.f32 %v184_v62, %v179_v7  ;;  %v259_v29 = vmul.f32 %v1799_v53, %v231_v8 }
 0x167   :  { %v240_v50 = vmul.f32 %v1936_v1, %v239_v44  ;;  %v381_v10 = vadd.f32 %v380_v30, %v375_v31  ;;  %v436_v23 = vadd.f32 %v435_v24, %v430_v32 }
 0x168   :  { %v191_v44 = vadd.f32 %v190_v19, %v185_v26  ;;  %v265_v32 = vadd.f32 %v264_v51, %v259_v29  ;;  %v2523_v19 = vld [vmem:[#allocation7_spill] sm:$0xff] }
 0x169   :  { %v386_v58 = vmul.f32 %v1857_v6, %v240_v50  ;;  %v441_v56 = vmul.f32 %v1842_v2, %v240_v50  ;;  %717 = vperm.xlu1 %1464, %v1837_v63   ;;  %v338_v6 = vadd.f32 %v337_v46, %v332_v28  ;;  %v392_v2 = vmul.f32 %v1773_v48, %v1734_v40 }
 0x16a   :  { %v242_v4 = vpop.permute.xlu1 %241  ;;  %v2000_v48 = vmul.f32 %v1979_v15, %v1903_v38  ;;  %v251_v38 = vpop.permute.xlu0 %250  ;;  %v276_v28 = vmul.f32 %v1865_v9, %v240_v50  ;;  %v197_v53 = vadd.f32 %v196_v37, %v191_v44  ;;  %v202_v46 = vmul.f32 %v1808_v55, %v1728_v36  ;;  %v2524_v55 = vld [vmem:[#allocation3_spill] sm:$0xff] }
 0x16b   :  { %v387_v16 = vadd.f32 %v386_v58, %v381_v10  ;;  %v442_v42 = vadd.f32 %v441_v56, %v436_v23  ;;  %v1982_v25 = vmul.f32 %v1958_v21, %v242_v4  ;;  %v447_v10 = vmul.f32 %v1874_v12, %v1734_v40 }
 0x16c   :  { %v344_v33 = vadd.f32 %v343_v14, %v338_v6  ;;  %v349_v31 = vmul.f32 %v1813_v57, %v2000_v48  ;;  %v252_v0 = vmul.f32 %v2012_v49, %v251_v38  ;;  %v208_v37 = vmul.f32 %v2524_v55, %v1967_v22  ;;  %v2528_v22 = vld [vmem:[#allocation9_spill] sm:$0xff] }
 0x16d   :  { %1466 = vset.pattern.permute.xlu1 %v2522_v35  ;;  %v393_v62 = vadd.f32 %v392_v2, %v387_v16  ;;  %v398_v61 = vmul.f32 %v1796_v52, %v1982_v25  ;;  %v448_v30 = vadd.f32 %v447_v10, %v442_v42  ;;  %v453_v12 = vmul.f32 %v1717_v27, %v1982_v25 }
 0x16e   :  { %v245_v11 = vpop.permute.xlu1 %244  ;;  %889 = vperm.xlu1 %1466, %v1805_v54   ;;  %v270_v52 = vmul.f32 %v1768_v47, %v237_v18  ;;  %v414_v4 = vpop.permute.xlu0 %413  ;;  %v471_v2 = vmul.f32 %v1940_v20, %v252_v0  ;;  %v2530_v44 = vmov 0.0  }
 0x16f   :  { %v246_v24 = vmul.f32 %v1979_v15, %v245_v11  ;;  %v399_v58 = vadd.f32 %v398_v61, %v393_v62  ;;  %v454_v8 = vadd.f32 %v453_v12, %v448_v30  ;;  %v2525_v62 = vld [vmem:[#allocation5_spill] sm:$0xff]  ;;  %v2526_v12 = vmov 6  }
 0x170   :  { %v271_v18 = vadd.f32 %v270_v52, %v265_v32  ;;  %v288_v11 = vmul.f32 %v2525_v62, %v1982_v25  ;;  %v214_v52 = vmul.f32 %v2528_v22, %v2000_v48  ;;  %v2531_v32 = vld [vmem:[#allocation8_spill] sm:$0xff] }
 0x171   :  { %v404_v13 = vmul.f32 %v1819_v59, %v246_v24  ;;  %v459_v27 = vmul.f32 %v1760_v45, %v246_v24  ;;  %v350_v45 = vadd.f32 %v349_v31, %v344_v33  ;;  %v355_v59 = vmul.f32 %v1906_v39, %v164_v43 }
 0x172   :  { %v248_v23 = vpop.permute.xlu1 %247  ;;  %1467 = vset.pattern.permute.xlu1 %v2520_v3  ;;  %v277_v7 = vadd.f32 %v276_v28, %v271_v18  ;;  %v203_v39 = vadd.f32 %v202_v46, %v197_v53  ;;  %v220_v28 = vmul.f32 %v2531_v32, %v164_v43 }
 0x173   :  { %v249_v47 = vmul.f32 %v1992_v41, %v248_v23  ;;  %643 = vperm.xlu1 %1467, %v1825_v60   ;;  %v405_v57 = vadd.f32 %v404_v13, %v399_v58  ;;  %v460_v50 = vadd.f32 %v459_v27, %v454_v8  ;;  %v356_v26 = vadd.f32 %v355_v59, %v350_v45  ;;  %v2529_v27 = vld [vmem:[#allocation10_spill] sm:$0xff] }
 0x174   :  { %v2532_v45 = vmov 7  }
 0x175   :  { %v410_v56 = vmul.f32 %v1855_v5, %v249_v47  ;;  %v465_v9 = vmul.f32 %v1898_v34, %v249_v47  ;;  %v282_v5 = vmul.f32 %v1887_v17, %v1734_v40  ;;  %v416_v34 = vmul.f32 %v414_v4, %v252_v0  ;;  %v2527_v17 = vld [vmem:[#allocation6_spill] sm:$0xff] }
 0x176   :  { %v166_v16 = vpop.permute.xlu1 %165  ;;  %v209_v40 = vadd.f32 %v208_v37, %v203_v39  ;;  %v294_v38 = vmul.f32 %v2527_v17, %v246_v24  ;;  %v300_v25 = vmul.f32 %v2529_v27, %v249_v47  ;;  %v304_v24 = vpop.permute.xlu0 %303 }
 0x177   :  { %v172_v42 = vmul.f32 %v2012_v49, %v166_v16  ;;  %v466_v6 = vadd.f32 %v465_v9, %v460_v50  ;;  %v411_v14 = vadd.f32 %v410_v56, %v405_v57  ;;  %723 = vperm.xlu1 %1467, %v1837_v63   ;;  %v283_v51 = vadd.f32 %v282_v5, %v277_v7  ;;  %v2533_v57 = vld [vmem:[#allocation4_spill] sm:$0xff]  ;;  %v1492_v56 = vld [vmem:[%s2470_s8] sm:$0xff]   ;;  %v1493_v9 = vld [vmem:[%s2470_s8 + $0x8] sm:$0xff]  }
 0x178   :  { %v215_v31 = vadd.f32 %v214_v52, %v209_v40  ;;  %v306_v48 = vmul.f32 %v304_v24, %v252_v0  ;;  %v2534_v0 = vmov 8   ;;  %v1494_v50 = vld [vmem:[%s2470_s8 + $0x10] ss:$0 sps:$4 sm:$0xff]  }
 0x179   :  { %v361_v10 = vmul.f32 %v2523_v19, %v172_v42  ;;  %v472_v36 = vadd.f32 %v471_v2, %v466_v6  ;;  %v417_v30 = vadd.f32 %v416_v34, %v411_v14  ;;  %v289_v13 = vadd.f32 %v288_v11, %v283_v51 }
 0x17a   :  { %v221_v53 = vadd.f32 %v220_v28, %v215_v31  ;;  %v503_v6 = vpop.permute.xlu0 %502 }
 0x17b   :  { %v362_v20 = vadd.f32 %v361_v10, %v356_v26  ;;  %v480_v61 = vpack.c.bf16 %v472_v36, %v472_v36  ;;  %1468 = vset.pattern.permute.xlu1 %v2526_v12  ;;  %v295_v23 = vadd.f32 %v294_v38, %v289_v13 }
 0x17c   :  { %895 = vperm.xlu1 %1468, %v1805_v54  }
 0x17d   :  { %v534_v33 = vsel %vm532_vm2, %v480_v61, 0  ;;  %v479_v29 = vpack.c.bf16 %v417_v30, %v362_v20  ;;  %v301_v58 = vadd.f32 %v300_v25, %v295_v23 }
 0x17e   :  { %1348 = vmatpush3.bf16.msra.mxu1 %v534_v33  ;;  %v2091_v14 = vpop.permute.xlu0 %957 }
 0x17f   :  { %1349 = vmatprep.subr.bf16.mxu1 %v2530_v44  ;;  %v307_v18 = vadd.f32 %v306_v48, %v301_v58 }
 0x180   :  { %1470 = vset.pattern.permute.xlu1 %v2522_v35 }
 0x181   :  { %729 = vperm.xlu1 %1470, %v1837_v63  }
 0x182   :  { %1350 = vmatpush3.bf16.msra.mxu1 %v479_v29  ;;  %v2095_v39 = vpop.permute.xlu0 %940 }
 0x183   :  { %v224_v8 = vpop.permute.xlu1 %223  ;;  %1351 = vmatprep.subr.bf16.mxu1 %v2530_v44 }
 0x184   :  { %v226_v47 = vmul.f32 %v224_v8, %v172_v42 }
 0x185   :  { %1471 = vset.pattern.permute.xlu1 %v2532_v45 }
 0x186   :  { %v227_v59 = vadd.f32 %v226_v47, %v221_v53  ;;  %821 = vperm.xlu1 %1471, %v2533_v57   ;;  %v2099_v26 = vpop.permute.xlu0 %860 }
 0x188   :  { %v478_v43 = vpack.c.bf16 %v307_v18, %v227_v59 }
 0x18a   :  { %1352 = vmatpush3.bf16.msra.mxu1 %v478_v43  ;;  %1472 = vset.pattern.permute.xlu1 %v2526_v12  ;;  %v2103_v10 = vpop.permute.xlu0 %620 }
 0x18b   :  { %655 = vperm.xlu1 %1472, %v1825_v60   ;;  %1383 = vmatprep.subr.bf16.mxu1 %v2530_v44 }
 0x18d   :  { %1354 = vmatmul.mubr.msk.bf16.vlgmr.msra.gmra.mxu1 %vm522_vm3, %v1492_v56 }
 0x18e   :  { %1357 = vmatprep.mubr.msk.bf16.mxu1 %vm1502_vm0, %v2530_v44  ;;  %v2107_v55 = vpop.permute.xlu0 %705 }
 0x18f   :  { %1474 = vset.pattern.permute.xlu1 %v2534_v0 }
 0x190   :  { %827 = vperm.xlu1 %1474, %v2533_v57  }
 0x192   :  { %v2113_v30 = vpop.permute.xlu0 %963 }
 0x193   :  { %2536 = vst [vmem:[#allocation3_spill] sm:$0xff] %v2113_v30 }
 0x194   :  { %907 = vperm.xlu1 %1474, %v1805_v54   ;;  %v2083_v54 = vpop.permute.xlu1 %506 }
 0x195   :  { %1358 = vmatmul.mubr.msk.bf16.gmra.mxu1 %vm522_vm3, %v1493_v9 }
 0x196   :  { %1361 = vmatprep.mubr.msk.bf16.mxu1 %vm1502_vm0, %v2530_v44  ;;  %v804_v52 = vpop.permute.xlu0 %803 }
 0x198   :  { %1476 = vset.pattern.permute.xlu1 %v2532_v45  ;;  %v498_v46 = vpop.permute.xlu1 %497 }
 0x199   :  { %741 = vperm.xlu1 %1476, %v1837_v63  }
 0x19c   :  { %v488_v4 = vpop.permute.xlu1 %487 }
 0x19d   :  { %1362 = vmatmul.mubr.msk.bf16.gmra.mxu1 %vm522_vm3, %v1494_v50  ;;  %1477 = vset.pattern.permute.xlu1 %v2534_v0  ;;  %v2548_v0 = vld [vmem:[#allocation11_spill] sm:$0xff] }
 0x19e   :  { %1385 = vmatprep.mubr.msk.bf16.mxu1 %vm1502_vm0, %v2530_v44  ;;  %v2549_v44 = vld [vmem:[#allocation12_spill] sm:$0xff] }
 0x1a0   :  { %v493_v7 = vpop.permute.xlu1 %492 }
 0x1a4   :  { %v2085_v16 = vpop.permute.xlu1 %945 }
 0x1a8   :  { %v2087_v42 = vpop.permute.xlu1 %951 }
 0x1ac   :  { %v2089_v2 = vpop.permute.xlu1 %780 }
 0x1b0   :  { %v2093_v5 = vpop.permute.xlu1 %785 }
 0x1b4   :  { %v2097_v34 = vpop.permute.xlu1 %865 }
 0x1b8   :  { %v2101_v19 = vpop.permute.xlu1 %791 }
 0x1bc   :  { %v2105_v36 = vpop.permute.xlu1 %871 }
 0x1c0   :  { %v2109_v51 = vpop.permute.xlu1 %969 }
 0x1c1   :  { %2535 = vst [vmem:[#allocation7_spill] sm:$0xff] %v2109_v51 }
 0x1c4   :  { %v2119_v17 = vpop.permute.xlu1 %625 }
 0x1c8   :  { %v2127_v31 = vpop.permute.xlu1 %700 }
 0x1cc   :  { %v2139_v58 = vpop.permute.xlu1 %797 }
 0x1d0   :  { %v2145_v53 = vpop.permute.xlu1 %877 }
 0x1d4   :  { %v2152_v47 = vpop.permute.xlu1 %631 }
 0x1d8   :  { %v2158_v57 = vpop.permute.xlu1 %711 }
 0x1dc   :  { %v2166_v43 = vpop.permute.xlu1 %883 }
 0x1e0   :  { %v2173_v9 = vpop.permute.xlu1 %637 }
 0x24d   :  { %v570_v37 = vpop.f32.mrf.mxu1 }
 0x24e   :  { %v571_v62 = vadd.f32 %v570_v37, %v488_v4  ;;  %v2200_v4 = vpop.permute.xlu0 %809 }
 0x24f   :  { %v1355_v11 = vpop.f32.mrf.mxu1 }
 0x250   :  { %v2111_v20 = vmax.f32 %v571_v62, 0.0  ;;  %v2537_v62 = vmov 9  }
 0x251   :  { %v573_v61 = vpop.f32.mrf.mxu1 }
 0x252   :  { %596 = vrot.lane.b32.xlu1 %v2111_v20, %s1513_s15  ;;  %593 = vrot.lane.b32.xlu0 %v2111_v20, %s1512_s14  ;;  %v574_v38 = vadd.f32 %v573_v61, %v493_v7 }
 0x253   :  { %v1356_v40 = vpop.f32.mrf.mxu1 }
 0x254   :  { %v2125_v13 = vmax.f32 %v574_v38, 0.0  ;;  %v2539_v40 = vmov 1  }
 0x255   :  { %v578_v33 = vpop.f32.mrf.mxu1 }
 0x256   :  { %v579_v29 = vadd.f32 %v578_v33, %v498_v46  ;;  %608 = vrot.lane.b32.xlu1 %v2111_v20, %s1517_s19  ;;  %599 = vrot.lane.b32.xlu0 %v2111_v20, %s1515_s17  ;;  %v2185_v46 = vpop.permute.xlu1 %717 }
 0x257   :  { %v1359_v22 = vpop.f32.mrf.mxu1 }
 0x258   :  { %v752_v27 = vmax.f32 %v579_v29, 0.0 }
 0x259   :  { %v581_v25 = vpop.f32.mrf.mxu1 }
 0x25a   :  { %v2129_v32 = vmul.f32 %v804_v52, %v752_v27  ;;  %602 = vrot.lane.b32.xlu0 %v2111_v20, %s1516_s18  ;;  %676 = vrot.lane.b32.xlu1 %v2125_v13, %s1513_s15  ;;  %v582_v59 = vadd.f32 %v581_v25, %v503_v6  ;;  %v2206_v6 = vpop.permute.xlu0 %649 }
 0x25b   :  { %v1360_v28 = vpop.f32.mrf.mxu1 }
 0x25c   :  { %v2156_v18 = vmax.f32 %v582_v59, 0.0  ;;  %v2542_v28 = vmov 0  }
 0x25d   :  { %v586_v23 = vpop.f32.mrf.mxu1 }
 0x25e   :  { %605 = vrot.lane.b32.xlu0 %v2111_v20, %s1511_s5  ;;  %679 = vrot.lane.b32.xlu1 %v2125_v13, %s1515_s17  ;;  %v587_v56 = vadd.f32 %v586_v23, %v2083_v54  ;;  %v2191_v54 = vpop.permute.xlu1 %889  ;;  %v2218_v11 = vpop.permute.xlu0 %975  ;;  %v2253_v23 = vld [vmem:[%s2473_s7] sm:$0xff] }
 0x25f   :  { %v1363_v24 = vpop.f32.mrf.mxu1  ;;  %2538 = vst [vmem:[#allocation5_spill] sm:$0xff] %v2218_v11 }
 0x260   :  { %v2179_v50 = vmax.f32 %v587_v56, 0.0  ;;  %v2547_v56 = vmov 3  }
 0x261   :  { %v589_v8 = vpop.f32.mrf.mxu1 }
 0x262   :  { %682 = vrot.lane.b32.xlu1 %v2125_v13, %s1516_s18  ;;  %673 = vrot.lane.b32.xlu0 %v2125_v13, %s1512_s14  ;;  %v2202_v7 = vpop.permute.xlu1 %643  ;;  %v2226_v38 = vpop.permute.xlu0 %815 }
 0x263   :  { %v1364_v48 = vpop.f32.mrf.mxu1 }
 0x264   :  { %v2544_v48 = vmov 2  }
 0x266   :  { %685 = vrot.lane.b32.xlu1 %v2125_v13, %s1511_s5  ;;  %756 = vrot.lane.b32.xlu0 %v752_v27, %s1513_s15  ;;  %v2208_v37 = vpop.permute.xlu1 %723  ;;  %v2234_v29 = vpop.permute.xlu0 %735 }
 0x267   :  { %2540 = vst [vmem:[#allocation6_spill] sm:$0xff] %v2234_v29 }
 0x26a   :  { %759 = vrot.lane.b32.xlu0 %v752_v27, %s1515_s17  ;;  %753 = vrot.lane.b32.xlu1 %v752_v27, %s1512_s14  ;;  %v2220_v61 = vpop.permute.xlu1 %895 }
 0x26e   :  { %762 = vrot.lane.b32.xlu0 %v752_v27, %s1516_s18  ;;  %768 = vrot.lane.b32.xlu1 %v752_v27, %s1517_s19  ;;  %v2228_v33 = vpop.permute.xlu1 %729 }
 0x272   :  { %765 = vrot.lane.b32.xlu0 %v752_v27, %s1511_s5  ;;  %833 = vrot.lane.b32.xlu1 %v2156_v18, %s1512_s14  ;;  %v2236_v22 = vpop.permute.xlu1 %821 }
 0x276   :  { %771 = vrot.lane.b32.xlu0 %v752_v27, %s1518_s20  ;;  %839 = vrot.lane.b32.xlu1 %v2156_v18, %s1515_s17  ;;  %v656_v52 = vpop.permute.xlu1 %655 }
 0x27a   :  { %836 = vrot.lane.b32.xlu0 %v2156_v18, %s1513_s15  ;;  %842 = vrot.lane.b32.xlu1 %v2156_v18, %s1516_s18  ;;  %v2246_v25 = vpop.permute.xlu1 %827 }
 0x27e   :  { %848 = vrot.lane.b32.xlu0 %v2156_v18, %s1517_s19  ;;  %845 = vrot.lane.b32.xlu1 %v2156_v18, %s1511_s5  ;;  %v2259_v8 = vpop.permute.xlu1 %907 }
 0x282   :  { %851 = vrot.lane.b32.xlu1 %v2156_v18, %s1518_s20  ;;  %913 = vrot.lane.b32.xlu0 %v2179_v50, %s1512_s14  ;;  %v2267_v59 = vpop.permute.xlu1 %741 }
 0x283   :  { %2546 = vst [vmem:[#allocation4_spill] sm:$0xff] %v2267_v59 }
 0x286   :  { %916 = vrot.lane.b32.xlu1 %v2179_v50, %s1513_s15  ;;  %922 = vrot.lane.b32.xlu0 %v2179_v50, %s1516_s18 }
 0x28a   :  { %919 = vrot.lane.b32.xlu1 %v2179_v50, %s1515_s17  ;;  %688 = vrot.lane.b32.xlu0 %v2125_v13, %s1517_s19 }
 0x28e   :  { %774 = vrot.lane.b32.xlu1 %v752_v27, %s1514_s16  ;;  %854 = vrot.lane.b32.xlu0 %v2156_v18, %s1514_s16 }
 0x292   :  { %667 = vperm.xlu1 %1477, %v1825_v60   ;;  %747 = vperm.xlu0 %1475, %v1837_v63  }
 0x296   :  { %925 = vrot.lane.b32.xlu1 %v2179_v50, %s1511_s5  ;;  %614 = vrot.lane.b32.xlu0 %v2111_v20, %s1514_s16 }
 0x297   :  { %1479 = vset.pattern.permute.xlu1 %v2537_v62  ;;  %1478 = vset.pattern.permute.xlu0 %v2537_v62 }
 0x29a   :  { %928 = vrot.lane.b32.xlu1 %v2179_v50, %s1517_s19  ;;  %1006 = vperm.xlu0 %1478, %v1825_v60   ;;  %v2240_v60 = vpop.permute.xlu0 %981 }
 0x29b   :  { %2541 = vst [vmem:[#allocation9_spill] sm:$0xff] %v2240_v60 }
 0x29e   :  { %931 = vrot.lane.b32.xlu1 %v2179_v50, %s1518_s20  ;;  %1481 = vset.pattern.permute.xlu0 %v2539_v40  ;;  %v2244_v27 = vpop.permute.xlu0 %901 }
 0x29f   :  { %1185 = vperm.xlu0 %1481, %v2253_v23  }
 0x2a2   :  { %934 = vrot.lane.b32.xlu1 %v2179_v50, %s1514_s16  ;;  %v2257_v24 = vpop.permute.xlu0 %661 }
 0x2a3   :  { %2543 = vst [vmem:[#allocation10_spill] sm:$0xff] %v2257_v24  ;;  %1486 = vset.pattern.permute.xlu0 %v2526_v12 }
 0x2a4   :  { %1215 = vperm.xlu0 %1486, %v2253_v23  }
 0x2a6   :  { %611 = vrot.lane.b32.xlu1 %v2111_v20, %s1518_s20 }
 0x2a8   :  { %1489 = vset.pattern.permute.xlu0 %v2537_v62 }
 0x2aa   :  { %691 = vrot.lane.b32.xlu1 %v2125_v13, %s1518_s20 }
 0x2ae   :  { %694 = vrot.lane.b32.xlu1 %v2125_v13, %s1514_s16 }
 0x2b2   :  { %1011 = vperm.xlu1 %1479, %v1837_v63   ;;  %v2265_v63 = vpop.permute.xlu0 %987 }
 0x2b3   :  { %2545 = vst [vmem:[#allocation8_spill] sm:$0xff] %v2265_v63  ;;  %v2550_v63 = vld [vmem:[#allocation13_spill] sm:$0xff] }
 0x2b6   :  { %1480 = vset.pattern.permute.xlu1 %v2542_v28 }
 0x2b7   :  { %1180 = vperm.xlu1 %1480, %v2253_v23  }
 0x2bb   :  { %1482 = vset.pattern.permute.xlu1 %v2544_v48 }
 0x2bc   :  { %1191 = vperm.xlu1 %1482, %v2253_v23  }
 0x2c0   :  { %1483 = vset.pattern.permute.xlu1 %v2547_v56 }
 0x2c1   :  { %1197 = vperm.xlu1 %1483, %v2253_v23  }
 0x2c4   :  { %v597_v40 = vpop.permute.xlu1 %596  ;;  %v594_v28 = vpop.permute.xlu0 %593 }
 0x2c5   :  { %v598_v48 = vmul.f32 %v2548_v0, %v597_v40  ;;  %v595_v12 = vmul.f32 %v2549_v44, %v594_v28  ;;  %1484 = vset.pattern.permute.xlu1 %v2520_v3 }
 0x2c6   :  { %1203 = vperm.xlu1 %1484, %v2253_v23  }
 0x2c7   :  { %v628_v59 = vmul.f32 %v2119_v17, %v598_v48  ;;  %v623_v56 = vmul.f32 %v2103_v10, %v595_v12 }
 0x2c8   :  { %v609_v24 = vpop.permute.xlu1 %608  ;;  %v600_v29 = vpop.permute.xlu0 %599 }
 0x2c9   :  { %v601_v62 = vmul.f32 %v2550_v63, %v600_v29  ;;  %v629_v11 = vadd.f32 %v628_v59, %v623_v56  ;;  %v646_v29 = vmul.f32 %v2202_v7, %v2111_v20 }
 0x2ca   :  { %1485 = vset.pattern.permute.xlu1 %v2522_v35  ;;  %v610_v35 = vmul.f32 %v1979_v15, %v609_v24 }
 0x2cb   :  { %v634_v60 = vmul.f32 %v2152_v47, %v601_v62  ;;  %1209 = vperm.xlu1 %1485, %v2253_v23  }
 0x2cc   :  { %v603_v40 = vpop.permute.xlu0 %602  ;;  %v677_v28 = vpop.permute.xlu1 %676 }
 0x2cd   :  { %v604_v3 = vmul.f32 %v1936_v1, %v603_v40  ;;  %v635_v51 = vadd.f32 %v634_v60, %v629_v11  ;;  %v678_v48 = vmul.f32 %v2548_v0, %v677_v28 }
 0x2cf   :  { %v640_v30 = vmul.f32 %v2173_v9, %v604_v3  ;;  %1487 = vset.pattern.permute.xlu1 %v2532_v45  ;;  %v658_v9 = vmul.f32 %v656_v52, %v610_v35  ;;  %v708_v20 = vmul.f32 %v2107_v55, %v678_v48  ;;  %v726_v55 = vmul.f32 %v2208_v37, %v2125_v13 }
 0x2d0   :  { %v606_v17 = vpop.permute.xlu0 %605  ;;  %v680_v10 = vpop.permute.xlu1 %679 }
 0x2d1   :  { %v641_v47 = vadd.f32 %v640_v30, %v635_v51  ;;  %v607_v62 = vmul.f32 %v1958_v21, %v606_v17  ;;  %v681_v45 = vmul.f32 %v2550_v63, %v680_v10 }
 0x2d3   :  { %v647_v59 = vadd.f32 %v646_v29, %v641_v47  ;;  %v652_v12 = vmul.f32 %v2206_v6, %v607_v62  ;;  %v714_v6 = vmul.f32 %v2158_v57, %v681_v45 }
 0x2d4   :  { %v683_v11 = vpop.permute.xlu1 %682  ;;  %v674_v60 = vpop.permute.xlu0 %673 }
 0x2d5   :  { %v653_v56 = vadd.f32 %v652_v12, %v647_v59  ;;  %v675_v40 = vmul.f32 %v2549_v44, %v674_v60  ;;  %v684_v7 = vmul.f32 %v1936_v1, %v683_v11 }
 0x2d7   :  { %v703_v51 = vmul.f32 %v2127_v31, %v675_v40  ;;  %v2296_v30 = vadd.f32 %v658_v9, %v653_v56  ;;  %v720_v52 = vmul.f32 %v2185_v46, %v684_v7 }
 0x2d8   :  { %v686_v24 = vpop.permute.xlu1 %685  ;;  %v757_v28 = vpop.permute.xlu0 %756 }
 0x2d9   :  { %v709_v3 = vadd.f32 %v708_v20, %v703_v51  ;;  %v687_v10 = vmul.f32 %v1958_v21, %v686_v24  ;;  %v758_v46 = vmul.f32 %v2548_v0, %v757_v28 }
 0x2db   :  { %v715_v17 = vadd.f32 %v714_v6, %v709_v3  ;;  %v732_v31 = vmul.f32 %v2228_v33, %v687_v10  ;;  %v788_v56 = vmul.f32 %v2093_v5, %v758_v46 }
 0x2dc   :  { %v760_v29 = vpop.permute.xlu0 %759  ;;  %v754_v35 = vpop.permute.xlu1 %753 }
 0x2dd   :  { %v721_v47 = vadd.f32 %v720_v52, %v715_v17  ;;  %v755_v57 = vmul.f32 %v2549_v44, %v754_v35  ;;  %v761_v13 = vmul.f32 %v2550_v63, %v760_v29 }
 0x2df   :  { %v727_v62 = vadd.f32 %v726_v55, %v721_v47  ;;  %v783_v9 = vmul.f32 %v2089_v2, %v755_v57  ;;  %v794_v7 = vmul.f32 %v2101_v19, %v761_v13 }
 0x2e0   :  { %v763_v48 = vpop.permute.xlu0 %762  ;;  %v769_v59 = vpop.permute.xlu1 %768 }
 0x2e1   :  { %v2304_v12 = vadd.f32 %v732_v31, %v727_v62  ;;  %v789_v40 = vadd.f32 %v788_v56, %v783_v9  ;;  %v764_v33 = vmul.f32 %v1936_v1, %v763_v48 }
 0x2e3   :  { %v795_v2 = vadd.f32 %v794_v7, %v789_v40  ;;  %v800_v5 = vmul.f32 %v2139_v58, %v764_v33 }
 0x2e4   :  { %v766_v11 = vpop.permute.xlu0 %765  ;;  %v834_v60 = vpop.permute.xlu1 %833 }
 0x2e5   :  { %v835_v20 = vmul.f32 %v2549_v44, %v834_v60  ;;  %v801_v55 = vadd.f32 %v800_v5, %v795_v2  ;;  %v767_v47 = vmul.f32 %v1958_v21, %v766_v11  ;;  %v770_v11 = vmul.f32 %v1979_v15, %v769_v59 }
 0x2e7   :  { %v863_v3 = vmul.f32 %v2099_v26, %v835_v20  ;;  %v807_v46 = vadd.f32 %v2129_v32, %v801_v55  ;;  %v812_v60 = vmul.f32 %v2200_v4, %v767_v47 }
 0x2e8   :  { %v772_v37 = vpop.permute.xlu0 %771  ;;  %v840_v45 = vpop.permute.xlu1 %839 }
 0x2e9   :  { %v841_v28 = vmul.f32 %v2550_v63, %v840_v45  ;;  %v813_v45 = vadd.f32 %v812_v60, %v807_v46  ;;  %v773_v40 = vmul.f32 %v1992_v41, %v772_v37 }
 0x2eb   :  { %v874_v35 = vmul.f32 %v2105_v36, %v841_v28 }
 0x2ec   :  { %v837_v51 = vpop.permute.xlu0 %836  ;;  %v843_v24 = vpop.permute.xlu1 %842 }
 0x2ed   :  { %v838_v6 = vmul.f32 %v2548_v0, %v837_v51  ;;  %v844_v17 = vmul.f32 %v1936_v1, %v843_v24  ;;  %v824_v51 = vmul.f32 %v2236_v22, %v773_v40 }
 0x2ef   :  { %v868_v52 = vmul.f32 %v2097_v34, %v838_v6  ;;  %v880_v31 = vmul.f32 %v2145_v53, %v844_v17  ;;  %v886_v34 = vmul.f32 %v2166_v43, %v2156_v18  ;;  %v818_v18 = vmul.f32 %v2226_v38, %v770_v11 }
 0x2f0   :  { %v849_v10 = vpop.permute.xlu0 %848  ;;  %v846_v29 = vpop.permute.xlu1 %845 }
 0x2f1   :  { %v869_v19 = vadd.f32 %v868_v52, %v863_v3  ;;  %v847_v26 = vmul.f32 %v1958_v21, %v846_v29  ;;  %v850_v13 = vmul.f32 %v1979_v15, %v849_v10  ;;  %v819_v4 = vadd.f32 %v818_v18, %v813_v45 }
 0x2f3   :  { %v875_v62 = vadd.f32 %v874_v35, %v869_v19  ;;  %v892_v53 = vmul.f32 %v2191_v54, %v847_v26  ;;  %v898_v32 = vmul.f32 %v2220_v61, %v850_v13  ;;  %v825_v2 = vadd.f32 %v824_v51, %v819_v4  ;;  %v2556_v4 = vld [vmem:[#allocation6_spill] sm:$0xff] }
 0x2f4   :  { %v852_v48 = vpop.permute.xlu1 %851  ;;  %v914_v57 = vpop.permute.xlu0 %913 }
 0x2f5   :  { %v881_v58 = vadd.f32 %v880_v31, %v875_v62  ;;  %v853_v43 = vmul.f32 %v1992_v41, %v852_v48  ;;  %v915_v10 = vmul.f32 %v2549_v44, %v914_v57 }
 0x2f7   :  { %v887_v36 = vadd.f32 %v886_v34, %v881_v58  ;;  %v904_v54 = vmul.f32 %v2244_v27, %v853_v43  ;;  %v943_v19 = vmul.f32 %v2095_v39, %v915_v10  ;;  %v2552_v58 = vld [vmem:[#allocation7_spill] sm:$0xff]  ;;  %v2553_v34 = vld [vmem:[#allocation5_spill] sm:$0xff] }
 0x2f8   :  { %v917_v9 = vpop.permute.xlu1 %916  ;;  %v923_v56 = vpop.permute.xlu0 %922 }
 0x2f9   :  { %v893_v33 = vadd.f32 %v892_v53, %v887_v36  ;;  %v918_v22 = vmul.f32 %v2548_v0, %v917_v9  ;;  %v2554_v36 = vld [vmem:[#allocation9_spill] sm:$0xff]  ;;  %v2555_v53 = vld [vmem:[#allocation8_spill] sm:$0xff] }
 0x2fb   :  { %v899_v59 = vadd.f32 %v898_v32, %v893_v33  ;;  %v948_v27 = vmul.f32 %v2085_v16, %v918_v22  ;;  %v2551_v16 = vld [vmem:[#allocation3_spill] sm:$0xff] }
 0x2fc   :  { %v920_v20 = vpop.permute.xlu1 %919  ;;  %v689_v7 = vpop.permute.xlu0 %688  ;;  %v966_v57 = vmul.f32 %v2551_v16, %v2179_v50  ;;  %v2561_v16 = vmov 9  }
 0x2fd   :  { %v905_v5 = vadd.f32 %v904_v54, %v899_v59  ;;  %v921_v29 = vmul.f32 %v2550_v63, %v920_v20  ;;  %v949_v47 = vadd.f32 %v948_v27, %v943_v19  ;;  %v690_v40 = vmul.f32 %v1979_v15, %v689_v7  ;;  %v2557_v59 = vld [vmem:[#allocation10_spill] sm:$0xff] }
 0x2fe   :  { %v1495_v27 = vld [vmem:[%s2472_s9] sm:$0xff]  }
 0x2ff   :  { %v954_v55 = vmul.f32 %v2087_v42, %v921_v29  ;;  %v738_v51 = vmul.f32 %v2556_v4, %v690_v40 }
 0x300   :  { %v775_v24 = vpop.permute.xlu1 %774  ;;  %v855_v28 = vpop.permute.xlu0 %854 }
 0x301   :  { %v776_v6 = vmul.f32 %v2012_v49, %v775_v24  ;;  %v856_v37 = vmul.f32 %v2012_v49, %v855_v28  ;;  %v955_v62 = vadd.f32 %v954_v55, %v949_v47 }
 0x303   :  { %v830_v38 = vmul.f32 %v2246_v25, %v776_v6  ;;  %v910_v61 = vmul.f32 %v2259_v8, %v856_v37  ;;  %v924_v25 = vmul.f32 %v1936_v1, %v923_v56  ;;  %v2558_v37 = vld [vmem:[#allocation4_spill] sm:$0xff] }
 0x305   :  { %v831_v3 = vadd.f32 %v830_v38, %v825_v2  ;;  %v911_v52 = vadd.f32 %v910_v61, %v905_v5  ;;  %v960_v31 = vmul.f32 %v2091_v14, %v924_v25  ;;  %v739_v5 = vadd.f32 %v738_v51, %v2304_v12 }
 0x307   :  { %v998_v17 = vpack.c.bf16 %v911_v52, %v831_v3  ;;  %v961_v44 = vadd.f32 %v960_v31, %v955_v62 }
 0x309   :  { %v967_v42 = vadd.f32 %v966_v57, %v961_v44 }
 0x30d   :  { %v668_v35 = vpop.permute.xlu1 %667  ;;  %v748_v11 = vpop.permute.xlu0 %747 }
 0x311   :  { %v926_v8 = vpop.permute.xlu1 %925  ;;  %v615_v32 = vpop.permute.xlu0 %614 }
 0x312   :  { %v927_v0 = vmul.f32 %v1958_v21, %v926_v8  ;;  %v616_v6 = vmul.f32 %v2012_v49, %v615_v32  ;;  %v1319_v32 = vld [vmem:[%s2471_s4 + $0xc] ss:$0 sm:$0xff] }
 0x314   :  { %v972_v39 = vmul.f32 %v2552_v58, %v927_v0  ;;  %v670_v3 = vmul.f32 %v668_v35, %v616_v6  ;;  %v2560_v0 = vmov 8   ;;  %v1498_v58 = vld [vmem:[%s2469_s6 + $0x18] sm:$0xff] }
 0x315   :  { %v929_v48 = vpop.permute.xlu1 %928 }
 0x316   :  { %v930_v63 = vmul.f32 %v1979_v15, %v929_v48  ;;  %v973_v60 = vadd.f32 %v972_v39, %v967_v42  ;;  %v2559_v15 = vmov 0.0   ;;  %v1499_v42 = vld [vmem:[%s2469_s6 + $0x20] sm:$0xff] }
 0x318   :  { %v978_v46 = vmul.f32 %v2553_v34, %v930_v63  ;;  %v1002_v34 = vld [vmem:[%s2469_s6 + $0x10] sm:$0xff] }
 0x319   :  { %v932_v26 = vpop.permute.xlu1 %931 }
 0x31a   :  { %v933_v1 = vmul.f32 %v1992_v41, %v932_v26  ;;  %v979_v21 = vadd.f32 %v978_v46, %v973_v60 }
 0x31c   :  { %v984_v14 = vmul.f32 %v2554_v36, %v933_v1 }
 0x31d   :  { %v935_v9 = vpop.permute.xlu1 %934 }
 0x31e   :  { %v936_v56 = vmul.f32 %v2012_v49, %v935_v9  ;;  %v985_v13 = vadd.f32 %v984_v14, %v979_v21 }
 0x320   :  { %v990_v45 = vmul.f32 %v2555_v53, %v936_v56  ;;  %v1317_v53 = vld [vmem:[%s2471_s4 + $0xa] ss:$0 sm:$0xff] }
 0x321   :  { %v612_v50 = vpop.permute.xlu1 %611 }
 0x322   :  { %v991_v33 = vadd.f32 %v990_v45, %v985_v13  ;;  %v613_v20 = vmul.f32 %v1992_v41, %v612_v50  ;;  %v1316_v45 = vld [vmem:[%s2471_s4 + $0x9] ss:$0 sm:$0xff] }
 0x324   :  { %v999_v18 = vpack.c.bf16 %v991_v33, %v991_v33  ;;  %v664_v24 = vmul.f32 %v2557_v59, %v613_v20 }
 0x325   :  { %v692_v43 = vpop.permute.xlu1 %691 }
 0x326   :  { %v693_v28 = vmul.f32 %v1992_v41, %v692_v43  ;;  %v1051_v54 = vsel %vm532_vm2, %v999_v18, 0  ;;  %v665_v38 = vadd.f32 %v664_v24, %v2296_v30  ;;  %v1497_v30 = vld [vmem:[%s2472_s9 + $0x10] ss:$0 sps:$4 sm:$0xff]  }
 0x327   :  { %1366 = vmatpush3.bf16.msra.mxu0 %v1051_v54 }
 0x328   :  { %v744_v2 = vmul.f32 %v2558_v37, %v693_v28  ;;  %1367 = vmatprep.subr.bf16.mxu0 %v2559_v15  ;;  %v671_v22 = vadd.f32 %v670_v3, %v665_v38 }
 0x329   :  { %v695_v7 = vpop.permute.xlu1 %694 }
 0x32a   :  { %v696_v61 = vmul.f32 %v2012_v49, %v695_v7  ;;  %v745_v52 = vadd.f32 %v744_v2, %v739_v5  ;;  %v1496_v49 = vld [vmem:[%s2472_s9 + $0x8] sm:$0xff]   ;;  %s1521_s9 = smov 18  }
 0x32b   :  { %1368 = vmatpush3.bf16.msra.mxu0 %v998_v17  ;;  %v1007_v17 = vpop.permute.xlu0 %1006  ;;  %v1320_v7 = vld [vmem:[%s2471_s4 + $0xe] ss:$0 sm:$0xff] }
 0x32c   :  { %v750_v41 = vmul.f32 %v748_v11, %v696_v61  ;;  %1369 = vmatprep.subr.bf16.mxu0 %v2559_v15 }
 0x32d   :  { %v1012_v19 = vpop.permute.xlu1 %1011 }
 0x32e   :  { %v751_v10 = vadd.f32 %v750_v41, %v745_v52  ;;  %v1322_v41 = vld [vmem:[%s2471_s4 + $0x10] ss:$0 sm:$0xff] }
 0x32f   :  { %v1186_v9 = vpop.permute.xlu0 %1185 }
 0x330   :  { %v997_v29 = vpack.c.bf16 %v751_v10, %v671_v22 }
 0x332   :  { %1370 = vmatpush3.bf16.msra.mxu0 %v997_v29  ;;  %v1181_v60 = vpop.permute.xlu1 %1180 }
 0x333   :  { %v1216_v56 = vpop.permute.xlu0 %1215 }
 0x335   :  { %1372 = vmatmul.mubr.msk.bf16.vlgmr.msra.gmra.mxu0 %vm522_vm3, %v1495_v27 }
 0x336   :  { %1375 = vmatprep.mubr.msk.bf16.mxu0 %vm1502_vm0, %v2559_v15 }
 0x337   :  { %v1192_v36 = vpop.permute.xlu1 %1191 }
 0x33c   :  { %v1198_v14 = vpop.permute.xlu1 %1197 }
 0x33d   :  { %1376 = vmatmul.mubr.msk.bf16.gmra.mxu0 %vm522_vm3, %v1496_v49 }
 0x33e   :  { %1379 = vmatprep.mubr.msk.bf16.mxu0 %vm1502_vm0, %v2559_v15  ;;  %v1321_v15 = vld [vmem:[%s2471_s4 + $0xf] ss:$0 sm:$0xff] }
 0x341   :  { %v1204_v21 = vpop.permute.xlu1 %1203 }
 0x345   :  { %1380 = vmatmul.mubr.msk.bf16.gmra.mxu0 %vm522_vm3, %v1497_v30 }
 0x346   :  { %v1210_v11 = vpop.permute.xlu1 %1209 }
 0x3f5   :  { %v1087_v12 = vpop.f32.mrf.mxu0 }
 0x3f6   :  { %v1088_v47 = vadd.f32 %v1087_v12, %v1007_v17  ;;  %v1323_v17 = vld [vmem:[%s2471_s4 + $0x11] ss:$0 sm:$0xff] }
 0x3f7   :  { %v1373_v35 = vpop.f32.mrf.mxu0 }
 0x3f9   :  { %v1090_v55 = vpop.f32.mrf.mxu0 }
 0x3fa   :  { %v1091_v25 = vadd.f32 %v1090_v55, %v1012_v19 }
 0x3fb   :  { %v1374_v8 = vpop.f32.mrf.mxu0 }
 0x3fc   :  { %v1109_v62 = vadd.f32 %v1091_v25, %v1088_v47 }
 0x3fd   :  { %v2402_v48 = vpop.f32.mrf.mxu0 }
 0x3fe   :  { %v2388_v31 = vmax.f32 %v1109_v62, 0.0  ;;  %1286 = vst [vmem:[%s2474_s11] sm:$0xff] %v1109_v62 }
 0x3ff   :  { %v1377_v44 = vpop.f32.mrf.mxu0 }
 0x400   :  { %1121 = vrot.lane.b32.xlu0 %v2388_v31, %s1520_s21  ;;  %1113 = vrot.lane.b32.xlu1 %v2388_v31, %s1521_s9  ;;  %v1206_v61 = vmul.f32 %v1204_v21, %v2388_v31 }
 0x401   :  { %v2406_v63 = vpop.f32.mrf.mxu0 }
 0x403   :  { %v1378_v57 = vpop.f32.mrf.mxu0 }
 0x404   :  { %1129 = vrot.lane.b32.xlu0 %v2388_v31, %s1522_s22  ;;  %1221 = vperm.xlu1 %1487, %v2253_v23  }
 0x405   :  { %v2412_v39 = vpop.f32.mrf.mxu0 }
 0x407   :  { %v1381_v26 = vpop.f32.mrf.mxu0 }
 0x408   :  { %1137 = vrot.lane.b32.xlu0 %v2388_v31, %s1523_s23  ;;  %1145 = vrot.lane.b32.xlu1 %v2388_v31, %s1524_s24 }
 0x409   :  { %1488 = vset.pattern.permute.xlu1 %v2560_v0  ;;  %v1106_v46 = vpop.f32.mrf.mxu0 }
 0x40a   :  { %v2562_v46 = vld [vmem:[#allocation2_spill] sm:$0xff] }
 0x40b   :  { %v1382_v1 = vpop.f32.mrf.mxu0 }
 0x40c   :  { %1153 = vrot.lane.b32.xlu0 %v2388_v31, %s1525_s0  ;;  %1227 = vperm.xlu1 %1488, %v2253_v23  }
 0x410   :  { %1161 = vrot.lane.b32.xlu0 %v2388_v31, %s1526_s1  ;;  %1169 = vrot.lane.b32.xlu1 %v2388_v31, %s1527_s2 }
 0x411   :  { %1490 = vset.pattern.permute.xlu1 %v2561_v16 }
 0x414   :  { %1021 = vperm.xlu1 %1490, %v1498_v58   ;;  %1016 = vperm.xlu0 %1489, %v1002_v34  }
 0x418   :  { %1025 = vperm.xlu1 %1490, %v1499_v42   ;;  %1235 = vperm.xlu0 %1489, %v2253_v23   ;;  %v1318_v23 = vld [vmem:[%s2471_s4 + $0xb] ss:$0 sm:$0xff]  ;;  %v1232_v42 = vld [vmem:[%s2475_s10] sm:$0xf] }
 0x472   :  { %v1122_v13 = vpop.permute.xlu0 %1121  ;;  %v1114_v50 = vpop.permute.xlu1 %1113 }
 0x473   :  { %v1128_v40 = vmul.f32 %v1317_v53, %v1122_v13  ;;  %v1120_v33 = vmul.f32 %v1316_v45, %v1114_v50 }
 0x475   :  { %v1188_v43 = vmul.f32 %v1186_v9, %v1128_v40  ;;  %v1183_v4 = vmul.f32 %v1181_v60, %v1120_v33 }
 0x476   :  { %v1130_v20 = vpop.permute.xlu0 %1129 }
 0x477   :  { %v1136_v18 = vmul.f32 %v1318_v23, %v1130_v20  ;;  %v1189_v28 = vadd.f32 %v1188_v43, %v1183_v4 }
 0x479   :  { %v1194_v24 = vmul.f32 %v1192_v36, %v1136_v18 }
 0x47a   :  { %v1138_v51 = vpop.permute.xlu0 %1137 }
 0x47b   :  { %v1144_v59 = vmul.f32 %v1319_v32, %v1138_v51  ;;  %v1195_v2 = vadd.f32 %v1194_v24, %v1189_v28 }
 0x47d   :  { %v1200_v54 = vmul.f32 %v1198_v14, %v1144_v59 }
 0x47e   :  { %v1154_v6 = vpop.permute.xlu0 %1153 }
 0x47f   :  { %v1222_v37 = vpop.permute.xlu1 %1221  ;;  %v1201_v5 = vadd.f32 %v1200_v54, %v1195_v2  ;;  %v1160_v3 = vmul.f32 %v1321_v15, %v1154_v6 }
 0x481   :  { %v1207_v10 = vadd.f32 %v1206_v61, %v1201_v5  ;;  %v1218_v49 = vmul.f32 %v1216_v56, %v1160_v3 }
 0x482   :  { %v1162_v22 = vpop.permute.xlu0 %1161 }
 0x483   :  { %v1146_v38 = vpop.permute.xlu1 %1145  ;;  %v1168_v30 = vmul.f32 %v1322_v41, %v1162_v22 }
 0x484   :  { %v1152_v52 = vmul.f32 %v1320_v7, %v1146_v38 }
 0x485   :  { %v1224_v55 = vmul.f32 %v1222_v37, %v1168_v30 }
 0x486   :  { %v1212_v29 = vmul.f32 %v1210_v11, %v1152_v52 }
 0x487   :  { %v1228_v27 = vpop.permute.xlu1 %1227 }
 0x488   :  { %v1213_v12 = vadd.f32 %v1212_v29, %v1207_v10 }
 0x48a   :  { %v1219_v35 = vadd.f32 %v1218_v49, %v1213_v12 }
 0x48b   :  { %v1170_v19 = vpop.permute.xlu1 %1169 }
 0x48c   :  { %v1176_v47 = vmul.f32 %v1323_v17, %v1170_v19  ;;  %v1225_v25 = vadd.f32 %v1224_v55, %v1219_v35 }
 0x48e   :  { %v1230_v8 = vmul.f32 %v1228_v27, %v1176_v47 }
 0x48f   :  { %v1022_v62 = vpop.permute.xlu1 %1021  ;;  %v1017_v26 = vpop.permute.xlu0 %1016 }
 0x490   :  { %v1231_v31 = vadd.f32 %v1230_v8, %v1225_v25  ;;  %v1099_v44 = vadd.f32 %v2406_v63, %v1022_v62  ;;  %v1096_v34 = vadd.f32 %v2402_v48, %v1017_v26 }
 0x492   :  { %v1233_v0 = vpack.c.bf16 %v1231_v31, %v1231_v31  ;;  %v1110_v60 = vadd.f32 %v1099_v44, %v1096_v34 }
 0x493   :  { %v1026_v16 = vpop.permute.xlu1 %1025  ;;  %v1236_v63 = vpop.permute.xlu0 %1235 }
 0x494   :  { %v1104_v57 = vadd.f32 %v2412_v39, %v1026_v16  ;;  %v1243_v58 = vsel %vm532_vm2, %v1233_v0, 0  ;;  %1287 = vst [vmem:[%s2474_s11 + $0x8] sm:$0xff] %v1110_v60 }
 0x495   :  { %1384 = vmatpush3.bf16.msra.mxu1 %v1243_v58 }
 0x496   :  { %v1111_v1 = vadd.f32 %v1104_v57, %v2562_v46 }
 0x498   :  { %1288 = vst [vmem:[%s2474_s11 + $0x10] sm:$0xff] %v1111_v1  ;;  %1386 = vmatmul.mubr.msk.bf16.vlgmr.msra.gmra.mxu1 %vm1238_vm4, %v1232_v42 }
 0x558   :  { %v1279_v39 = vpop.f32.mrf.mxu1 }
 0x559   :  { %v1280_v36 = vadd.f32 %v1279_v39, %v1236_v63 }
 0x55a   :  { %v1387_v14 = vpop.f32.mrf.mxu1 }
 0x55b   :  { %v1285_v9 = vadd.f32 %v1280_v36, %v2562_v46 }
 0x55c   :  { %v1282_v21 = vpop.f32.mrf.mxu1 }
 0x55d   :  { %1289 = vst [vmem:[%s2474_s11 + $0x18] sm:$0xff] %v1285_v9 }
 0x55e   :  { %v1388_v48 = vpop.f32.mrf.mxu1 }

</bundles_post_ra>
